<compile_context>
chip_gen: v6e
topology: v6e:2x2x1
jax: 0.10.0
libtpu: 0.0.40
codegen_flags: <defaults>
</compile_context>

<pallas_src>
from collections import OrderedDict
import functools

import numpy as np
import jax
import jax.numpy as jnp
from jax.experimental import pallas as pl
from jax.experimental.pallas import tpu as pltpu


# ------------------------- synthetic M configuration ------------------------
M_DIC = {
    'head': {
        'order': ['lcmap', 'lcoff', 'lleng', 'angle'],
        'lcmap': {'head_size': 2, 'loss': 'CE',         'loss_weight': 8.0},
        'lcoff': {'head_size': 2, 'loss': 'sigmoid_L1', 'loss_weight': 0.25},
        'lleng': {'head_size': 1, 'loss': 'sigmoid_L1', 'loss_weight': 1.0},
        'angle': {'head_size': 1, 'loss': 'sigmoid_L1', 'loss_weight': 1.0},
    }
}
_HEAD_SIZES = [M_DIC['head'][h]['head_size'] for h in M_DIC['head']['order']]
HEAD_OFF = np.cumsum(_HEAD_SIZES)                 # [2, 4, 5, 6]
C_TOTAL = int(HEAD_OFF[-1])                       # 6 output channels

IDX_LCMAP = 0
IDX_LCOFF = int(HEAD_OFF[0])                      # 2
IDX_LLENG = int(HEAD_OFF[1])                      # 4
IDX_ANGLE = int(HEAD_OFF[2])                      # 5


# ------------------------------- fused kernel --------------------------------
def _fclip_fused_kernel(x_ref, w_ref, b_ref,
                        lcmap_t_ref, lcoff_t_ref, lleng_t_ref, angle_t_ref,
                        feat_ref, lcmap_hm_ref, lcoff_hm_ref,
                        lleng_hm_ref, angle_hm_ref, loss_ref,
                        acc_ref, *, cin, weights, hw_total):
    """One (batch b, spatial tile s) grid step.

    Block shapes (TS = spatial rows per tile, LANE = 128 when possible):
      x_ref        (1, Cin,     TS, LANE)   image tile
      w_ref        (Cin, C_TOTAL)           SMEM scalars
      b_ref        (1,   C_TOTAL)           SMEM scalars
      *_t_ref      (1, {1,2},   TS, LANE)   targets (lcmap target == mask)
      feat_ref     (1, C_TOTAL, TS, LANE)   raw projection (the "feature")
      *_hm_ref     (1, {1,2},   TS, LANE)   heatmaps
      loss_ref     (1, 1, 4)                per-image weighted losses (finalize)
      acc_ref      (1, 8) VMEM scratch      running sums across spatial tiles
                   [0]=ce  [1]=lcoff  [2]=lleng  [3]=angle  [4]=sum(mask)
    """
    s_i = pl.program_id(1)
    n_s = pl.num_programs(1)

    @pl.when(s_i == 0)
    def _init():
        acc_ref[...] = jnp.zeros_like(acc_ref)

    def conv_channel(c):
        # Pointwise conv as VPU broadcast-MACs over Cin (MXU would be >95% idle
        # at Cout=6); scalar weights come from SMEM.  Result is (TS, LANE).
        acc = b_ref[0, c] + w_ref[0, c] * x_ref[0, 0]
        for k in range(1, cin):
            acc = acc + w_ref[k, c] * x_ref[0, k]
        return acc

    def tsum(v):                               # full-tile sum -> (1, 1)
        return jnp.sum(jnp.sum(v, axis=1, keepdims=True), axis=0, keepdims=True)

    mask = lcmap_t_ref[0, 0]                   # lcmap target doubles as the mask
    acc_ref[:, 4:5] += tsum(mask)

    # ---- lcmap head: 2-way softmax heatmap + CE loss ------------------------
    # With d = l1 - l0:  softmax[:,1] = sigmoid(d)
    #   ce = t*(logz - l1) + (1-t)*(logz - l0) = softplus(-d) + (1 - t) * d
    l0 = conv_channel(IDX_LCMAP)
    l1 = conv_channel(IDX_LCMAP + 1)
    feat_ref[0, IDX_LCMAP] = l0
    feat_ref[0, IDX_LCMAP + 1] = l1
    d = l1 - l0
    lcmap_hm_ref[0, 0] = jax.nn.sigmoid(d)
    softplus_neg_d = jnp.maximum(-d, 0.0) + jnp.log(1.0 + jnp.exp(-jnp.abs(d)))
    ce = softplus_neg_d + (1.0 - mask) * d
    acc_ref[:, 0:1] += tsum(ce)

    # ---- lcoff head: (sigmoid - 0.5), masked L1 ------------------------------
    off_num = jnp.zeros((1, 1), jnp.float32)
    for j in range(2):
        logit = conv_channel(IDX_LCOFF + j)
        feat_ref[0, IDX_LCOFF + j] = logit
        p = jax.nn.sigmoid(logit) - 0.5
        lcoff_hm_ref[0, j] = p
        off_num = off_num + tsum(jnp.abs(p - lcoff_t_ref[0, j]) * mask)
    acc_ref[:, 1:2] += off_num

    # ---- lleng head: sigmoid_L1, masked --------------------------------------
    logit = conv_channel(IDX_LLENG)
    feat_ref[0, IDX_LLENG] = logit
    p = jax.nn.sigmoid(logit)
    lleng_hm_ref[0, 0] = p
    acc_ref[:, 2:3] += tsum(jnp.abs(p - lleng_t_ref[0, 0]) * mask)

    # ---- angle head: sigmoid_L1, masked --------------------------------------
    logit = conv_channel(IDX_ANGLE)
    feat_ref[0, IDX_ANGLE] = logit
    p = jax.nn.sigmoid(logit)
    angle_hm_ref[0, 0] = p
    acc_ref[:, 3:4] += tsum(jnp.abs(p - angle_t_ref[0, 0]) * mask)

    # ---- finalize per-image losses on the last spatial tile -------------------
    # mean(|.| * mask / mean(mask)) == sum(|.| * mask) / sum(mask), with the
    # mean(mask)==0 -> 1 special case giving 0 (numerator is 0 then).
    @pl.when(s_i == n_s - 1)
    def _finalize():
        msk = acc_ref[:, 4:5]
        denom = jnp.where(msk > 0.0, msk, hw_total)
        inv = 1.0 / denom                                    # once per image
        loss_ref[0, :, 0:1] = acc_ref[:, 0:1] * (weights[0] / hw_total)
        loss_ref[0, :, 1:2] = acc_ref[:, 1:2] * inv * weights[1]
        loss_ref[0, :, 2:3] = acc_ref[:, 2:3] * inv * weights[2]
        loss_ref[0, :, 3:4] = acc_ref[:, 3:4] * inv * weights[3]


def _pick_row_tile(s, target=32):
    """Spatial-row tile: multiple of 8 dividing s, capped (keeps vreg live
    ranges ~4 vregs/value and blocks well inside scoped VMEM)."""
    if s <= target:
        return s
    for t in range(target, 0, -8):
        if t % 8 == 0 and s % t == 0:
            return t
    return s


def fclip_stage1_forward(image, w, b, target):
    """Fused backbone-projection + heads.  Returns (feature, heatmaps, loss)."""
    B, Cin, H, W = image.shape
    HW = H * W
    # Lane-dense spatial layout: (H, W) -> (S, LANE) with LANE=128 when possible.
    LANE = 128 if HW % 128 == 0 else W
    S = HW // LANE
    TS = _pick_row_tile(S)
    n_s = S // TS

    f32 = jnp.float32
    x = image.astype(f32).reshape(B, Cin, S, LANE)                 # reshape only
    lcmap_t = target['lcmap'].astype(f32).reshape(B, 1, S, LANE)
    lcoff_t = target['lcoff'].astype(f32).reshape(B, 2, S, LANE)   # no permute needed
    lleng_t = target['lleng'].astype(f32).reshape(B, 1, S, LANE)
    angle_t = target['angle'].astype(f32).reshape(B, 1, S, LANE)
    w2 = w.astype(f32)                                             # (Cin, C_TOTAL) -> SMEM
    b2 = b.astype(f32).reshape(1, C_TOTAL)                         # -> SMEM

    weights = tuple(float(M_DIC['head'][h]['loss_weight'])
                    for h in M_DIC['head']['order'])
    kernel = functools.partial(_fclip_fused_kernel,
                               cin=Cin, weights=weights, hw_total=float(HW))

    def tile_spec(nch):
        return pl.BlockSpec((1, nch, TS, LANE), lambda bi, si: (bi, 0, si, 0))

    smem_spec = pl.BlockSpec(memory_space=pltpu.MemorySpace.SMEM)

    out_shapes = (
        jax.ShapeDtypeStruct((B, C_TOTAL, S, LANE), f32),   # feature (raw projection)
        jax.ShapeDtypeStruct((B, 1, S, LANE), f32),         # lcmap heatmap
        jax.ShapeDtypeStruct((B, 2, S, LANE), f32),         # lcoff heatmap
        jax.ShapeDtypeStruct((B, 1, S, LANE), f32),         # lleng heatmap
        jax.ShapeDtypeStruct((B, 1, S, LANE), f32),         # angle heatmap
        jax.ShapeDtypeStruct((B, 1, 4), f32),               # weighted per-head losses
    )

    # Keep double-buffered blocks inside the scoped VMEM budget (16 MiB v5e /
    # 32 MiB v6e-v7x default; 64 MiB physical on v7x).
    block_bytes = 4 * TS * LANE * (Cin + 5 + C_TOTAL + 5)
    vmem_limit = int(min(96 * 1024 * 1024, max(32 * 1024 * 1024, 4 * block_bytes)))

    feature, lcmap_hm, lcoff_hm, lleng_hm, angle_hm, loss = pl.pallas_call(
        kernel,
        out_shape=out_shapes,
        grid=(B, n_s),
        in_specs=[
            tile_spec(Cin),     # image tile
            smem_spec,          # conv weights (Cin, C_TOTAL)
            smem_spec,          # conv bias (1, C_TOTAL)
            tile_spec(1),       # lcmap target / mask
            tile_spec(2),       # lcoff target
            tile_spec(1),       # lleng target
            tile_spec(1),       # angle target
        ],
        out_specs=(
            tile_spec(C_TOTAL),
            tile_spec(1),
            tile_spec(2),
            tile_spec(1),
            tile_spec(1),
            pl.BlockSpec((1, 1, 4), lambda bi, si: (bi, 0, 0)),  # resident across si
        ),
        scratch_shapes=[pltpu.VMEM((1, 8), jnp.float32)],
        compiler_params=pltpu.CompilerParams(
            dimension_semantics=("parallel", "arbitrary"),
            vmem_limit_bytes=vmem_limit),
    )(x, w2, b2, lcmap_t, lcoff_t, lleng_t, angle_t)

    # Free reshapes back to the module's NCHW-style layouts.
    feature = feature.reshape(B, C_TOTAL, H, W)
    heatmaps = {
        'lcmap': lcmap_hm.reshape(B, H, W),
        'lcoff': lcoff_hm.reshape(B, 2, H, W),
        'lleng': lleng_hm.reshape(B, H, W),
        'angle': angle_hm.reshape(B, H, W),
    }
    return feature, heatmaps, loss.reshape(B, 4)


# ------------------------------- FClip module ---------------------------------
class FClipPallas:
    def __init__(self, backbone_params):
        self.w, self.b = backbone_params
        self.M_dic = M_DIC
        self._get_head_size()

    def _get_head_size(self):
        head_size = [[self.M_dic['head'][h]['head_size']]
                     for h in self.M_dic['head']['order']]
        self.head_off = np.cumsum([sum(h) for h in head_size])

    def forward(self, input_dict, is_test=False):
        if is_test:
            return None                        # test_forward is `pass` in the source
        return self.trainval_forward(input_dict)

    def trainval_forward(self, input_dict):
        image = input_dict['image']
        target = input_dict['target']

        # Single fused pallas_call: projection ("backbone" stand-in) + all heads.
        # TODO(synk): real stacked-hourglass backbone produces multiple stacks;
        # the synthetic backbone yields a single stack.
        feature, heatmap, loss_mat = fclip_stage1_forward(
            image, self.w, self.b, target)

        result = {'feature': feature}
        losses, accuracy = [], []
        for stack in range(1):                 # single synthetic stack
            L = OrderedDict()
            for k, name in enumerate(self.M_dic['head']['order']):
                L[name] = loss_mat[:, k]
            losses.append(L)
            accuracy.append(OrderedDict())
            if stack == 0 and input_dict['do_evaluation']:
                result['heatmaps'] = heatmap

        result['losses'] = losses
        result['accuracy'] = accuracy
        return result


# ----------------------------------- main --------------------------------------
if __name__ == "__main__":
    key = jax.random.PRNGKey(0)
    B, Cin, H, W = 2, 4, 16, 16
    k_img, k_w, k_b, k1, k2, k3, k4 = jax.random.split(key, 7)

    image = jax.random.normal(k_img, (B, Cin, H, W), jnp.float32)
    w_conv = jax.random.normal(k_w, (Cin, C_TOTAL), jnp.float32) * 0.1
    b_conv = jax.random.normal(k_b, (C_TOTAL,), jnp.float32) * 0.1

    target = {
        'lcmap': (jax.random.uniform(k1, (B, H, W)) > 0.7).astype(jnp.float32),
        'lcoff': jax.random.uniform(k2, (B, 2, H, W), minval=-0.5, maxval=0.5),
        'lleng': jax.random.uniform(k3, (B, H, W)),
        'angle': jax.random.uniform(k4, (B, H, W)),
    }

    model = FClipPallas((w_conv, b_conv))
    result = model.forward(
        {'image': image, 'target': target, 'do_evaluation': True}, is_test=False)

    jax.block_until_ready(result)
    print("KERNEL_OK")
</pallas_src>

<mosaic_0001>
module attributes {stable_mosaic.version = 11 : i64} {
  func.func @_fclip_fused_kernel(%arg0: i32, %arg1: i32, %arg2: memref<1x4x2x128xf32, #tpu.memory_space<vmem>>, %arg3: memref<4x6xf32, #tpu.memory_space<smem>>, %arg4: memref<1x6xf32, #tpu.memory_space<smem>>, %arg5: memref<1x1x2x128xf32, #tpu.memory_space<vmem>>, %arg6: memref<1x2x2x128xf32, #tpu.memory_space<vmem>>, %arg7: memref<1x1x2x128xf32, #tpu.memory_space<vmem>>, %arg8: memref<1x1x2x128xf32, #tpu.memory_space<vmem>>, %arg9: memref<1x6x2x128xf32, #tpu.memory_space<vmem>>, %arg10: memref<1x1x2x128xf32, #tpu.memory_space<vmem>>, %arg11: memref<1x2x2x128xf32, #tpu.memory_space<vmem>>, %arg12: memref<1x1x2x128xf32, #tpu.memory_space<vmem>>, %arg13: memref<1x1x2x128xf32, #tpu.memory_space<vmem>>, %arg14: memref<1x1x4xf32, #tpu.memory_space<vmem>>, %arg15: memref<1x8xf32, #tpu.memory_space<vmem>>) attributes {dimension_semantics = [#tpu.dimension_semantics<parallel>, #tpu.dimension_semantics<arbitrary>], iteration_bounds = array<i64: 2, 1>, scalar_prefetch = 0 : i64, scratch_operands = 1 : i64, tpu.core_type = #tpu.core_type<tc>, window_params = [{transform_indices = @transform_0, window_bounds = array<i64: 1, 4, 2, 128>}, {transform_indices = @transform_1, window_bounds = array<i64: 4, 6>}, {transform_indices = @transform_2, window_bounds = array<i64: 1, 6>}, {transform_indices = @transform_3, window_bounds = array<i64: 1, 1, 2, 128>}, {transform_indices = @transform_4, window_bounds = array<i64: 1, 2, 2, 128>}, {transform_indices = @transform_5, window_bounds = array<i64: 1, 1, 2, 128>}, {transform_indices = @transform_6, window_bounds = array<i64: 1, 1, 2, 128>}, {transform_indices = @transform_7, window_bounds = array<i64: 1, 6, 2, 128>}, {transform_indices = @transform_8, window_bounds = array<i64: 1, 1, 2, 128>}, {transform_indices = @transform_9, window_bounds = array<i64: 1, 2, 2, 128>}, {transform_indices = @transform_10, window_bounds = array<i64: 1, 1, 2, 128>}, {transform_indices = @transform_11, window_bounds = array<i64: 1, 1, 2, 128>}, {transform_indices = @transform_12, window_bounds = array<i64: 1, 1, 4>}]} {
    %c0_i32 = arith.constant 0 : i32
    %0 = arith.cmpi eq, %arg1, %c0_i32 : i32
    %1 = arith.extui %0 : i1 to i32
    %c0_i32_0 = arith.constant 0 : i32
    %2 = arith.cmpi ne, %1, %c0_i32_0 : i32
    scf.if %2 {
      %cst_261 = arith.constant 0.000000e+00 : f32
      %305 = vector.broadcast %cst_261 : f32 to vector<1x8xf32>
      %c0_262 = arith.constant 0 : index
      %c0_263 = arith.constant 0 : index
      %306 = vector.load %arg15[%c0_262, %c0_263] : memref<1x8xf32, #tpu.memory_space<vmem>>, vector<1x8xf32>
      tpu.vector_store %arg15[%c0_262, %c0_263], %305 {strides = array<i32>} : memref<1x8xf32, #tpu.memory_space<vmem>>, vector<1x8xf32>,
    } else {
    }
    %c0 = arith.constant 0 : index
    %c0_1 = arith.constant 0 : index
    %c0_2 = arith.constant 0 : index
    %c0_3 = arith.constant 0 : index
    %3 = vector.load %arg5[%c0, %c0_1, %c0_2, %c0_3] : memref<1x1x2x128xf32, #tpu.memory_space<vmem>>, vector<1x1x2x128xf32>
    %4 = vector.shape_cast %3 : vector<1x1x2x128xf32> to vector<2x128xf32>
    %c0_4 = arith.constant 0 : index
    %c4 = arith.constant 4 : index
    %5 = vector.load %arg15[%c0_4, %c4] : memref<1x8xf32, #tpu.memory_space<vmem>>, vector<1x1xf32>
    %cst = arith.constant dense<0.000000e+00> : vector<2xf32>
    %6 = vector.multi_reduction <add>, %4, %cst [1] : vector<2x128xf32> to vector<2xf32>
    %7 = vector.shape_cast %6 : vector<2xf32> to vector<2x1xf32>
    %cst_5 = arith.constant dense<0.000000e+00> : vector<1xf32>
    %8 = vector.multi_reduction <add>, %7, %cst_5 [0] : vector<2x1xf32> to vector<1xf32>
    %9 = vector.shape_cast %8 : vector<1xf32> to vector<1x1xf32>
    %10 = arith.addf %5, %9 : vector<1x1xf32>
    %c0_6 = arith.constant 0 : index
    %c4_7 = arith.constant 4 : index
    %11 = vector.load %arg15[%c0_6, %c4_7] : memref<1x8xf32, #tpu.memory_space<vmem>>, vector<1x1xf32>
    tpu.vector_store %arg15[%c0_6, %c4_7], %10 {strides = array<i32>} : memref<1x8xf32, #tpu.memory_space<vmem>>, vector<1x1xf32>,
    %c0_8 = arith.constant 0 : index
    %c0_9 = arith.constant 0 : index
    %12 = memref.load %arg4[%c0_8, %c0_9] : memref<1x6xf32, #tpu.memory_space<smem>>
    %c0_10 = arith.constant 0 : index
    %c0_11 = arith.constant 0 : index
    %13 = memref.load %arg3[%c0_10, %c0_11] : memref<4x6xf32, #tpu.memory_space<smem>>
    %c0_12 = arith.constant 0 : index
    %c0_13 = arith.constant 0 : index
    %c0_14 = arith.constant 0 : index
    %c0_15 = arith.constant 0 : index
    %14 = vector.load %arg2[%c0_12, %c0_13, %c0_14, %c0_15] : memref<1x4x2x128xf32, #tpu.memory_space<vmem>>, vector<1x1x2x128xf32>
    %15 = vector.shape_cast %14 : vector<1x1x2x128xf32> to vector<2x128xf32>
    %16 = vector.broadcast %13 : f32 to vector<2x128xf32>
    %17 = arith.mulf %16, %15 : vector<2x128xf32>
    %18 = vector.broadcast %12 : f32 to vector<2x128xf32>
    %19 = arith.addf %18, %17 : vector<2x128xf32>
    %c1 = arith.constant 1 : index
    %c0_16 = arith.constant 0 : index
    %20 = memref.load %arg3[%c1, %c0_16] : memref<4x6xf32, #tpu.memory_space<smem>>
    %c0_17 = arith.constant 0 : index
    %c1_18 = arith.constant 1 : index
    %c0_19 = arith.constant 0 : index
    %c0_20 = arith.constant 0 : index
    %21 = vector.load %arg2[%c0_17, %c1_18, %c0_19, %c0_20] : memref<1x4x2x128xf32, #tpu.memory_space<vmem>>, vector<1x1x2x128xf32>
    %22 = vector.shape_cast %21 : vector<1x1x2x128xf32> to vector<2x128xf32>
    %23 = vector.broadcast %20 : f32 to vector<2x128xf32>
    %24 = arith.mulf %23, %22 : vector<2x128xf32>
    %25 = arith.addf %19, %24 : vector<2x128xf32>
    %c2 = arith.constant 2 : index
    %c0_21 = arith.constant 0 : index
    %26 = memref.load %arg3[%c2, %c0_21] : memref<4x6xf32, #tpu.memory_space<smem>>
    %c0_22 = arith.constant 0 : index
    %c2_23 = arith.constant 2 : index
    %c0_24 = arith.constant 0 : index
    %c0_25 = arith.constant 0 : index
    %27 = vector.load %arg2[%c0_22, %c2_23, %c0_24, %c0_25] : memref<1x4x2x128xf32, #tpu.memory_space<vmem>>, vector<1x1x2x128xf32>
    %28 = vector.shape_cast %27 : vector<1x1x2x128xf32> to vector<2x128xf32>
    %29 = vector.broadcast %26 : f32 to vector<2x128xf32>
    %30 = arith.mulf %29, %28 : vector<2x128xf32>
    %31 = arith.addf %25, %30 : vector<2x128xf32>
    %c3 = arith.constant 3 : index
    %c0_26 = arith.constant 0 : index
    %32 = memref.load %arg3[%c3, %c0_26] : memref<4x6xf32, #tpu.memory_space<smem>>
    %c0_27 = arith.constant 0 : index
    %c3_28 = arith.constant 3 : index
    %c0_29 = arith.constant 0 : index
    %c0_30 = arith.constant 0 : index
    %33 = vector.load %arg2[%c0_27, %c3_28, %c0_29, %c0_30] : memref<1x4x2x128xf32, #tpu.memory_space<vmem>>, vector<1x1x2x128xf32>
    %34 = vector.shape_cast %33 : vector<1x1x2x128xf32> to vector<2x128xf32>
    %35 = vector.broadcast %32 : f32 to vector<2x128xf32>
    %36 = arith.mulf %35, %34 : vector<2x128xf32>
    %37 = arith.addf %31, %36 : vector<2x128xf32>
    %c0_31 = arith.constant 0 : index
    %c1_32 = arith.constant 1 : index
    %38 = memref.load %arg4[%c0_31, %c1_32] : memref<1x6xf32, #tpu.memory_space<smem>>
    %c0_33 = arith.constant 0 : index
    %c1_34 = arith.constant 1 : index
    %39 = memref.load %arg3[%c0_33, %c1_34] : memref<4x6xf32, #tpu.memory_space<smem>>
    %c0_35 = arith.constant 0 : index
    %c0_36 = arith.constant 0 : index
    %c0_37 = arith.constant 0 : index
    %c0_38 = arith.constant 0 : index
    %40 = vector.load %arg2[%c0_35, %c0_36, %c0_37, %c0_38] : memref<1x4x2x128xf32, #tpu.memory_space<vmem>>, vector<1x1x2x128xf32>
    %41 = vector.shape_cast %40 : vector<1x1x2x128xf32> to vector<2x128xf32>
    %42 = vector.broadcast %39 : f32 to vector<2x128xf32>
    %43 = arith.mulf %42, %41 : vector<2x128xf32>
    %44 = vector.broadcast %38 : f32 to vector<2x128xf32>
    %45 = arith.addf %44, %43 : vector<2x128xf32>
    %c1_39 = arith.constant 1 : index
    %c1_40 = arith.constant 1 : index
    %46 = memref.load %arg3[%c1_39, %c1_40] : memref<4x6xf32, #tpu.memory_space<smem>>
    %c0_41 = arith.constant 0 : index
    %c1_42 = arith.constant 1 : index
    %c0_43 = arith.constant 0 : index
    %c0_44 = arith.constant 0 : index
    %47 = vector.load %arg2[%c0_41, %c1_42, %c0_43, %c0_44] : memref<1x4x2x128xf32, #tpu.memory_space<vmem>>, vector<1x1x2x128xf32>
    %48 = vector.shape_cast %47 : vector<1x1x2x128xf32> to vector<2x128xf32>
    %49 = vector.broadcast %46 : f32 to vector<2x128xf32>
    %50 = arith.mulf %49, %48 : vector<2x128xf32>
    %51 = arith.addf %45, %50 : vector<2x128xf32>
    %c2_45 = arith.constant 2 : index
    %c1_46 = arith.constant 1 : index
    %52 = memref.load %arg3[%c2_45, %c1_46] : memref<4x6xf32, #tpu.memory_space<smem>>
    %c0_47 = arith.constant 0 : index
    %c2_48 = arith.constant 2 : index
    %c0_49 = arith.constant 0 : index
    %c0_50 = arith.constant 0 : index
    %53 = vector.load %arg2[%c0_47, %c2_48, %c0_49, %c0_50] : memref<1x4x2x128xf32, #tpu.memory_space<vmem>>, vector<1x1x2x128xf32>
    %54 = vector.shape_cast %53 : vector<1x1x2x128xf32> to vector<2x128xf32>
    %55 = vector.broadcast %52 : f32 to vector<2x128xf32>
    %56 = arith.mulf %55, %54 : vector<2x128xf32>
    %57 = arith.addf %51, %56 : vector<2x128xf32>
    %c3_51 = arith.constant 3 : index
    %c1_52 = arith.constant 1 : index
    %58 = memref.load %arg3[%c3_51, %c1_52] : memref<4x6xf32, #tpu.memory_space<smem>>
    %c0_53 = arith.constant 0 : index
    %c3_54 = arith.constant 3 : index
    %c0_55 = arith.constant 0 : index
    %c0_56 = arith.constant 0 : index
    %59 = vector.load %arg2[%c0_53, %c3_54, %c0_55, %c0_56] : memref<1x4x2x128xf32, #tpu.memory_space<vmem>>, vector<1x1x2x128xf32>
    %60 = vector.shape_cast %59 : vector<1x1x2x128xf32> to vector<2x128xf32>
    %61 = vector.broadcast %58 : f32 to vector<2x128xf32>
    %62 = arith.mulf %61, %60 : vector<2x128xf32>
    %63 = arith.addf %57, %62 : vector<2x128xf32>
    %c0_57 = arith.constant 0 : index
    %c0_58 = arith.constant 0 : index
    %c0_59 = arith.constant 0 : index
    %c0_60 = arith.constant 0 : index
    %64 = vector.load %arg9[%c0_57, %c0_58, %c0_59, %c0_60] : memref<1x6x2x128xf32, #tpu.memory_space<vmem>>, vector<1x1x2x128xf32>
    %65 = vector.shape_cast %64 : vector<1x1x2x128xf32> to vector<2x128xf32>
    %66 = vector.shape_cast %37 : vector<2x128xf32> to vector<1x1x2x128xf32>
    tpu.vector_store %arg9[%c0_57, %c0_58, %c0_59, %c0_60], %66 {strides = array<i32>} : memref<1x6x2x128xf32, #tpu.memory_space<vmem>>, vector<1x1x2x128xf32>,
    %c0_61 = arith.constant 0 : index
    %c1_62 = arith.constant 1 : index
    %c0_63 = arith.constant 0 : index
    %c0_64 = arith.constant 0 : index
    %67 = vector.load %arg9[%c0_61, %c1_62, %c0_63, %c0_64] : memref<1x6x2x128xf32, #tpu.memory_space<vmem>>, vector<1x1x2x128xf32>
    %68 = vector.shape_cast %67 : vector<1x1x2x128xf32> to vector<2x128xf32>
    %69 = vector.shape_cast %63 : vector<2x128xf32> to vector<1x1x2x128xf32>
    tpu.vector_store %arg9[%c0_61, %c1_62, %c0_63, %c0_64], %69 {strides = array<i32>} : memref<1x6x2x128xf32, #tpu.memory_space<vmem>>, vector<1x1x2x128xf32>,
    %70 = arith.subf %63, %37 : vector<2x128xf32>
    %71 = arith.negf %70 : vector<2x128xf32>
    %72 = math.exp %71 : vector<2x128xf32>
    %cst_65 = arith.constant 1.000000e+00 : f32
    %73 = vector.broadcast %cst_65 : f32 to vector<2x128xf32>
    %74 = arith.addf %73, %72 : vector<2x128xf32>
    %75 = arith.divf %73, %74 : vector<2x128xf32>
    %c0_66 = arith.constant 0 : index
    %c0_67 = arith.constant 0 : index
    %c0_68 = arith.constant 0 : index
    %c0_69 = arith.constant 0 : index
    %76 = vector.load %arg10[%c0_66, %c0_67, %c0_68, %c0_69] : memref<1x1x2x128xf32, #tpu.memory_space<vmem>>, vector<1x1x2x128xf32>
    %77 = vector.shape_cast %76 : vector<1x1x2x128xf32> to vector<2x128xf32>
    %78 = vector.shape_cast %75 : vector<2x128xf32> to vector<1x1x2x128xf32>
    tpu.vector_store %arg10[%c0_66, %c0_67, %c0_68, %c0_69], %78 {strides = array<i32>} : memref<1x1x2x128xf32, #tpu.memory_space<vmem>>, vector<1x1x2x128xf32>,
    %cst_70 = arith.constant 0.000000e+00 : f32
    %79 = vector.broadcast %cst_70 : f32 to vector<2x128xf32>
    %80 = arith.subf %79, %70 : vector<2x128xf32>
    %cst_71 = arith.constant 0.000000e+00 : f32
    %81 = vector.broadcast %cst_71 : f32 to vector<2x128xf32>
    %82 = arith.maximumf %80, %81 : vector<2x128xf32>
    %83 = math.absf %70 : vector<2x128xf32>
    %cst_72 = arith.constant 0.000000e+00 : f32
    %84 = vector.broadcast %cst_72 : f32 to vector<2x128xf32>
    %85 = arith.subf %84, %83 : vector<2x128xf32>
    %86 = math.exp %85 : vector<2x128xf32>
    %cst_73 = arith.constant 1.000000e+00 : f32
    %87 = vector.broadcast %cst_73 : f32 to vector<2x128xf32>
    %88 = arith.addf %87, %86 : vector<2x128xf32>
    %89 = math.log %88 : vector<2x128xf32>
    %90 = arith.addf %82, %89 : vector<2x128xf32>
    %cst_74 = arith.constant 1.000000e+00 : f32
    %91 = vector.broadcast %cst_74 : f32 to vector<2x128xf32>
    %92 = arith.subf %91, %4 : vector<2x128xf32>
    %93 = arith.mulf %92, %70 : vector<2x128xf32>
    %94 = arith.addf %90, %93 : vector<2x128xf32>
    %c0_75 = arith.constant 0 : index
    %c0_76 = arith.constant 0 : index
    %95 = vector.load %arg15[%c0_75, %c0_76] : memref<1x8xf32, #tpu.memory_space<vmem>>, vector<1x1xf32>
    %cst_77 = arith.constant dense<0.000000e+00> : vector<2xf32>
    %96 = vector.multi_reduction <add>, %94, %cst_77 [1] : vector<2x128xf32> to vector<2xf32>
    %97 = vector.shape_cast %96 : vector<2xf32> to vector<2x1xf32>
    %cst_78 = arith.constant dense<0.000000e+00> : vector<1xf32>
    %98 = vector.multi_reduction <add>, %97, %cst_78 [0] : vector<2x1xf32> to vector<1xf32>
    %99 = vector.shape_cast %98 : vector<1xf32> to vector<1x1xf32>
    %100 = arith.addf %95, %99 : vector<1x1xf32>
    %c0_79 = arith.constant 0 : index
    %c0_80 = arith.constant 0 : index
    %101 = vector.load %arg15[%c0_79, %c0_80] : memref<1x8xf32, #tpu.memory_space<vmem>>, vector<1x1xf32>
    tpu.vector_store %arg15[%c0_79, %c0_80], %100 {strides = array<i32>} : memref<1x8xf32, #tpu.memory_space<vmem>>, vector<1x1xf32>,
    %cst_81 = arith.constant 0.000000e+00 : f32
    %102 = vector.broadcast %cst_81 : f32 to vector<1x1xf32>
    %c0_82 = arith.constant 0 : index
    %c2_83 = arith.constant 2 : index
    %103 = memref.load %arg4[%c0_82, %c2_83] : memref<1x6xf32, #tpu.memory_space<smem>>
    %c0_84 = arith.constant 0 : index
    %c2_85 = arith.constant 2 : index
    %104 = memref.load %arg3[%c0_84, %c2_85] : memref<4x6xf32, #tpu.memory_space<smem>>
    %c0_86 = arith.constant 0 : index
    %c0_87 = arith.constant 0 : index
    %c0_88 = arith.constant 0 : index
    %c0_89 = arith.constant 0 : index
    %105 = vector.load %arg2[%c0_86, %c0_87, %c0_88, %c0_89] : memref<1x4x2x128xf32, #tpu.memory_space<vmem>>, vector<1x1x2x128xf32>
    %106 = vector.shape_cast %105 : vector<1x1x2x128xf32> to vector<2x128xf32>
    %107 = vector.broadcast %104 : f32 to vector<2x128xf32>
    %108 = arith.mulf %107, %106 : vector<2x128xf32>
    %109 = vector.broadcast %103 : f32 to vector<2x128xf32>
    %110 = arith.addf %109, %108 : vector<2x128xf32>
    %c1_90 = arith.constant 1 : index
    %c2_91 = arith.constant 2 : index
    %111 = memref.load %arg3[%c1_90, %c2_91] : memref<4x6xf32, #tpu.memory_space<smem>>
    %c0_92 = arith.constant 0 : index
    %c1_93 = arith.constant 1 : index
    %c0_94 = arith.constant 0 : index
    %c0_95 = arith.constant 0 : index
    %112 = vector.load %arg2[%c0_92, %c1_93, %c0_94, %c0_95] : memref<1x4x2x128xf32, #tpu.memory_space<vmem>>, vector<1x1x2x128xf32>
    %113 = vector.shape_cast %112 : vector<1x1x2x128xf32> to vector<2x128xf32>
    %114 = vector.broadcast %111 : f32 to vector<2x128xf32>
    %115 = arith.mulf %114, %113 : vector<2x128xf32>
    %116 = arith.addf %110, %115 : vector<2x128xf32>
    %c2_96 = arith.constant 2 : index
    %c2_97 = arith.constant 2 : index
    %117 = memref.load %arg3[%c2_96, %c2_97] : memref<4x6xf32, #tpu.memory_space<smem>>
    %c0_98 = arith.constant 0 : index
    %c2_99 = arith.constant 2 : index
    %c0_100 = arith.constant 0 : index
    %c0_101 = arith.constant 0 : index
    %118 = vector.load %arg2[%c0_98, %c2_99, %c0_100, %c0_101] : memref<1x4x2x128xf32, #tpu.memory_space<vmem>>, vector<1x1x2x128xf32>
    %119 = vector.shape_cast %118 : vector<1x1x2x128xf32> to vector<2x128xf32>
    %120 = vector.broadcast %117 : f32 to vector<2x128xf32>
    %121 = arith.mulf %120, %119 : vector<2x128xf32>
    %122 = arith.addf %116, %121 : vector<2x128xf32>
    %c3_102 = arith.constant 3 : index
    %c2_103 = arith.constant 2 : index
    %123 = memref.load %arg3[%c3_102, %c2_103] : memref<4x6xf32, #tpu.memory_space<smem>>
    %c0_104 = arith.constant 0 : index
    %c3_105 = arith.constant 3 : index
    %c0_106 = arith.constant 0 : index
    %c0_107 = arith.constant 0 : index
    %124 = vector.load %arg2[%c0_104, %c3_105, %c0_106, %c0_107] : memref<1x4x2x128xf32, #tpu.memory_space<vmem>>, vector<1x1x2x128xf32>
    %125 = vector.shape_cast %124 : vector<1x1x2x128xf32> to vector<2x128xf32>
    %126 = vector.broadcast %123 : f32 to vector<2x128xf32>
    %127 = arith.mulf %126, %125 : vector<2x128xf32>
    %128 = arith.addf %122, %127 : vector<2x128xf32>
    %c0_108 = arith.constant 0 : index
    %c2_109 = arith.constant 2 : index
    %c0_110 = arith.constant 0 : index
    %c0_111 = arith.constant 0 : index
    %129 = vector.load %arg9[%c0_108, %c2_109, %c0_110, %c0_111] : memref<1x6x2x128xf32, #tpu.memory_space<vmem>>, vector<1x1x2x128xf32>
    %130 = vector.shape_cast %129 : vector<1x1x2x128xf32> to vector<2x128xf32>
    %131 = vector.shape_cast %128 : vector<2x128xf32> to vector<1x1x2x128xf32>
    tpu.vector_store %arg9[%c0_108, %c2_109, %c0_110, %c0_111], %131 {strides = array<i32>} : memref<1x6x2x128xf32, #tpu.memory_space<vmem>>, vector<1x1x2x128xf32>,
    %132 = arith.negf %128 : vector<2x128xf32>
    %133 = math.exp %132 : vector<2x128xf32>
    %cst_112 = arith.constant 1.000000e+00 : f32
    %134 = vector.broadcast %cst_112 : f32 to vector<2x128xf32>
    %135 = arith.addf %134, %133 : vector<2x128xf32>
    %136 = arith.divf %134, %135 : vector<2x128xf32>
    %cst_113 = arith.constant 5.000000e-01 : f32
    %137 = vector.broadcast %cst_113 : f32 to vector<2x128xf32>
    %138 = arith.subf %136, %137 : vector<2x128xf32>
    %c0_114 = arith.constant 0 : index
    %c0_115 = arith.constant 0 : index
    %c0_116 = arith.constant 0 : index
    %c0_117 = arith.constant 0 : index
    %139 = vector.load %arg11[%c0_114, %c0_115, %c0_116, %c0_117] : memref<1x2x2x128xf32, #tpu.memory_space<vmem>>, vector<1x1x2x128xf32>
    %140 = vector.shape_cast %139 : vector<1x1x2x128xf32> to vector<2x128xf32>
    %141 = vector.shape_cast %138 : vector<2x128xf32> to vector<1x1x2x128xf32>
    tpu.vector_store %arg11[%c0_114, %c0_115, %c0_116, %c0_117], %141 {strides = array<i32>} : memref<1x2x2x128xf32, #tpu.memory_space<vmem>>, vector<1x1x2x128xf32>,
    %c0_118 = arith.constant 0 : index
    %c0_119 = arith.constant 0 : index
    %c0_120 = arith.constant 0 : index
    %c0_121 = arith.constant 0 : index
    %142 = vector.load %arg6[%c0_118, %c0_119, %c0_120, %c0_121] : memref<1x2x2x128xf32, #tpu.memory_space<vmem>>, vector<1x1x2x128xf32>
    %143 = vector.shape_cast %142 : vector<1x1x2x128xf32> to vector<2x128xf32>
    %144 = arith.subf %138, %143 : vector<2x128xf32>
    %145 = math.absf %144 : vector<2x128xf32>
    %146 = arith.mulf %145, %4 : vector<2x128xf32>
    %cst_122 = arith.constant dense<0.000000e+00> : vector<2xf32>
    %147 = vector.multi_reduction <add>, %146, %cst_122 [1] : vector<2x128xf32> to vector<2xf32>
    %148 = vector.shape_cast %147 : vector<2xf32> to vector<2x1xf32>
    %cst_123 = arith.constant dense<0.000000e+00> : vector<1xf32>
    %149 = vector.multi_reduction <add>, %148, %cst_123 [0] : vector<2x1xf32> to vector<1xf32>
    %150 = vector.shape_cast %149 : vector<1xf32> to vector<1x1xf32>
    %151 = arith.addf %102, %150 : vector<1x1xf32>
    %c0_124 = arith.constant 0 : index
    %c3_125 = arith.constant 3 : index
    %152 = memref.load %arg4[%c0_124, %c3_125] : memref<1x6xf32, #tpu.memory_space<smem>>
    %c0_126 = arith.constant 0 : index
    %c3_127 = arith.constant 3 : index
    %153 = memref.load %arg3[%c0_126, %c3_127] : memref<4x6xf32, #tpu.memory_space<smem>>
    %c0_128 = arith.constant 0 : index
    %c0_129 = arith.constant 0 : index
    %c0_130 = arith.constant 0 : index
    %c0_131 = arith.constant 0 : index
    %154 = vector.load %arg2[%c0_128, %c0_129, %c0_130, %c0_131] : memref<1x4x2x128xf32, #tpu.memory_space<vmem>>, vector<1x1x2x128xf32>
    %155 = vector.shape_cast %154 : vector<1x1x2x128xf32> to vector<2x128xf32>
    %156 = vector.broadcast %153 : f32 to vector<2x128xf32>
    %157 = arith.mulf %156, %155 : vector<2x128xf32>
    %158 = vector.broadcast %152 : f32 to vector<2x128xf32>
    %159 = arith.addf %158, %157 : vector<2x128xf32>
    %c1_132 = arith.constant 1 : index
    %c3_133 = arith.constant 3 : index
    %160 = memref.load %arg3[%c1_132, %c3_133] : memref<4x6xf32, #tpu.memory_space<smem>>
    %c0_134 = arith.constant 0 : index
    %c1_135 = arith.constant 1 : index
    %c0_136 = arith.constant 0 : index
    %c0_137 = arith.constant 0 : index
    %161 = vector.load %arg2[%c0_134, %c1_135, %c0_136, %c0_137] : memref<1x4x2x128xf32, #tpu.memory_space<vmem>>, vector<1x1x2x128xf32>
    %162 = vector.shape_cast %161 : vector<1x1x2x128xf32> to vector<2x128xf32>
    %163 = vector.broadcast %160 : f32 to vector<2x128xf32>
    %164 = arith.mulf %163, %162 : vector<2x128xf32>
    %165 = arith.addf %159, %164 : vector<2x128xf32>
    %c2_138 = arith.constant 2 : index
    %c3_139 = arith.constant 3 : index
    %166 = memref.load %arg3[%c2_138, %c3_139] : memref<4x6xf32, #tpu.memory_space<smem>>
    %c0_140 = arith.constant 0 : index
    %c2_141 = arith.constant 2 : index
    %c0_142 = arith.constant 0 : index
    %c0_143 = arith.constant 0 : index
    %167 = vector.load %arg2[%c0_140, %c2_141, %c0_142, %c0_143] : memref<1x4x2x128xf32, #tpu.memory_space<vmem>>, vector<1x1x2x128xf32>
    %168 = vector.shape_cast %167 : vector<1x1x2x128xf32> to vector<2x128xf32>
    %169 = vector.broadcast %166 : f32 to vector<2x128xf32>
    %170 = arith.mulf %169, %168 : vector<2x128xf32>
    %171 = arith.addf %165, %170 : vector<2x128xf32>
    %c3_144 = arith.constant 3 : index
    %c3_145 = arith.constant 3 : index
    %172 = memref.load %arg3[%c3_144, %c3_145] : memref<4x6xf32, #tpu.memory_space<smem>>
    %c0_146 = arith.constant 0 : index
    %c3_147 = arith.constant 3 : index
    %c0_148 = arith.constant 0 : index
    %c0_149 = arith.constant 0 : index
    %173 = vector.load %arg2[%c0_146, %c3_147, %c0_148, %c0_149] : memref<1x4x2x128xf32, #tpu.memory_space<vmem>>, vector<1x1x2x128xf32>
    %174 = vector.shape_cast %173 : vector<1x1x2x128xf32> to vector<2x128xf32>
    %175 = vector.broadcast %172 : f32 to vector<2x128xf32>
    %176 = arith.mulf %175, %174 : vector<2x128xf32>
    %177 = arith.addf %171, %176 : vector<2x128xf32>
    %c0_150 = arith.constant 0 : index
    %c3_151 = arith.constant 3 : index
    %c0_152 = arith.constant 0 : index
    %c0_153 = arith.constant 0 : index
    %178 = vector.load %arg9[%c0_150, %c3_151, %c0_152, %c0_153] : memref<1x6x2x128xf32, #tpu.memory_space<vmem>>, vector<1x1x2x128xf32>
    %179 = vector.shape_cast %178 : vector<1x1x2x128xf32> to vector<2x128xf32>
    %180 = vector.shape_cast %177 : vector<2x128xf32> to vector<1x1x2x128xf32>
    tpu.vector_store %arg9[%c0_150, %c3_151, %c0_152, %c0_153], %180 {strides = array<i32>} : memref<1x6x2x128xf32, #tpu.memory_space<vmem>>, vector<1x1x2x128xf32>,
    %181 = arith.negf %177 : vector<2x128xf32>
    %182 = math.exp %181 : vector<2x128xf32>
    %cst_154 = arith.constant 1.000000e+00 : f32
    %183 = vector.broadcast %cst_154 : f32 to vector<2x128xf32>
    %184 = arith.addf %183, %182 : vector<2x128xf32>
    %185 = arith.divf %183, %184 : vector<2x128xf32>
    %cst_155 = arith.constant 5.000000e-01 : f32
    %186 = vector.broadcast %cst_155 : f32 to vector<2x128xf32>
    %187 = arith.subf %185, %186 : vector<2x128xf32>
    %c0_156 = arith.constant 0 : index
    %c1_157 = arith.constant 1 : index
    %c0_158 = arith.constant 0 : index
    %c0_159 = arith.constant 0 : index
    %188 = vector.load %arg11[%c0_156, %c1_157, %c0_158, %c0_159] : memref<1x2x2x128xf32, #tpu.memory_space<vmem>>, vector<1x1x2x128xf32>
    %189 = vector.shape_cast %188 : vector<1x1x2x128xf32> to vector<2x128xf32>
    %190 = vector.shape_cast %187 : vector<2x128xf32> to vector<1x1x2x128xf32>
    tpu.vector_store %arg11[%c0_156, %c1_157, %c0_158, %c0_159], %190 {strides = array<i32>} : memref<1x2x2x128xf32, #tpu.memory_space<vmem>>, vector<1x1x2x128xf32>,
    %c0_160 = arith.constant 0 : index
    %c1_161 = arith.constant 1 : index
    %c0_162 = arith.constant 0 : index
    %c0_163 = arith.constant 0 : index
    %191 = vector.load %arg6[%c0_160, %c1_161, %c0_162, %c0_163] : memref<1x2x2x128xf32, #tpu.memory_space<vmem>>, vector<1x1x2x128xf32>
    %192 = vector.shape_cast %191 : vector<1x1x2x128xf32> to vector<2x128xf32>
    %193 = arith.subf %187, %192 : vector<2x128xf32>
    %194 = math.absf %193 : vector<2x128xf32>
    %195 = arith.mulf %194, %4 : vector<2x128xf32>
    %cst_164 = arith.constant dense<0.000000e+00> : vector<2xf32>
    %196 = vector.multi_reduction <add>, %195, %cst_164 [1] : vector<2x128xf32> to vector<2xf32>
    %197 = vector.shape_cast %196 : vector<2xf32> to vector<2x1xf32>
    %cst_165 = arith.constant dense<0.000000e+00> : vector<1xf32>
    %198 = vector.multi_reduction <add>, %197, %cst_165 [0] : vector<2x1xf32> to vector<1xf32>
    %199 = vector.shape_cast %198 : vector<1xf32> to vector<1x1xf32>
    %200 = arith.addf %151, %199 : vector<1x1xf32>
    %c0_166 = arith.constant 0 : index
    %c1_167 = arith.constant 1 : index
    %201 = vector.load %arg15[%c0_166, %c1_167] : memref<1x8xf32, #tpu.memory_space<vmem>>, vector<1x1xf32>
    %202 = arith.addf %201, %200 : vector<1x1xf32>
    %c0_168 = arith.constant 0 : index
    %c1_169 = arith.constant 1 : index
    %203 = vector.load %arg15[%c0_168, %c1_169] : memref<1x8xf32, #tpu.memory_space<vmem>>, vector<1x1xf32>
    tpu.vector_store %arg15[%c0_168, %c1_169], %202 {strides = array<i32>} : memref<1x8xf32, #tpu.memory_space<vmem>>, vector<1x1xf32>,
    %c0_170 = arith.constant 0 : index
    %c4_171 = arith.constant 4 : index
    %204 = memref.load %arg4[%c0_170, %c4_171] : memref<1x6xf32, #tpu.memory_space<smem>>
    %c0_172 = arith.constant 0 : index
    %c4_173 = arith.constant 4 : index
    %205 = memref.load %arg3[%c0_172, %c4_173] : memref<4x6xf32, #tpu.memory_space<smem>>
    %c0_174 = arith.constant 0 : index
    %c0_175 = arith.constant 0 : index
    %c0_176 = arith.constant 0 : index
    %c0_177 = arith.constant 0 : index
    %206 = vector.load %arg2[%c0_174, %c0_175, %c0_176, %c0_177] : memref<1x4x2x128xf32, #tpu.memory_space<vmem>>, vector<1x1x2x128xf32>
    %207 = vector.shape_cast %206 : vector<1x1x2x128xf32> to vector<2x128xf32>
    %208 = vector.broadcast %205 : f32 to vector<2x128xf32>
    %209 = arith.mulf %208, %207 : vector<2x128xf32>
    %210 = vector.broadcast %204 : f32 to vector<2x128xf32>
    %211 = arith.addf %210, %209 : vector<2x128xf32>
    %c1_178 = arith.constant 1 : index
    %c4_179 = arith.constant 4 : index
    %212 = memref.load %arg3[%c1_178, %c4_179] : memref<4x6xf32, #tpu.memory_space<smem>>
    %c0_180 = arith.constant 0 : index
    %c1_181 = arith.constant 1 : index
    %c0_182 = arith.constant 0 : index
    %c0_183 = arith.constant 0 : index
    %213 = vector.load %arg2[%c0_180, %c1_181, %c0_182, %c0_183] : memref<1x4x2x128xf32, #tpu.memory_space<vmem>>, vector<1x1x2x128xf32>
    %214 = vector.shape_cast %213 : vector<1x1x2x128xf32> to vector<2x128xf32>
    %215 = vector.broadcast %212 : f32 to vector<2x128xf32>
    %216 = arith.mulf %215, %214 : vector<2x128xf32>
    %217 = arith.addf %211, %216 : vector<2x128xf32>
    %c2_184 = arith.constant 2 : index
    %c4_185 = arith.constant 4 : index
    %218 = memref.load %arg3[%c2_184, %c4_185] : memref<4x6xf32, #tpu.memory_space<smem>>
    %c0_186 = arith.constant 0 : index
    %c2_187 = arith.constant 2 : index
    %c0_188 = arith.constant 0 : index
    %c0_189 = arith.constant 0 : index
    %219 = vector.load %arg2[%c0_186, %c2_187, %c0_188, %c0_189] : memref<1x4x2x128xf32, #tpu.memory_space<vmem>>, vector<1x1x2x128xf32>
    %220 = vector.shape_cast %219 : vector<1x1x2x128xf32> to vector<2x128xf32>
    %221 = vector.broadcast %218 : f32 to vector<2x128xf32>
    %222 = arith.mulf %221, %220 : vector<2x128xf32>
    %223 = arith.addf %217, %222 : vector<2x128xf32>
    %c3_190 = arith.constant 3 : index
    %c4_191 = arith.constant 4 : index
    %224 = memref.load %arg3[%c3_190, %c4_191] : memref<4x6xf32, #tpu.memory_space<smem>>
    %c0_192 = arith.constant 0 : index
    %c3_193 = arith.constant 3 : index
    %c0_194 = arith.constant 0 : index
    %c0_195 = arith.constant 0 : index
    %225 = vector.load %arg2[%c0_192, %c3_193, %c0_194, %c0_195] : memref<1x4x2x128xf32, #tpu.memory_space<vmem>>, vector<1x1x2x128xf32>
    %226 = vector.shape_cast %225 : vector<1x1x2x128xf32> to vector<2x128xf32>
    %227 = vector.broadcast %224 : f32 to vector<2x128xf32>
    %228 = arith.mulf %227, %226 : vector<2x128xf32>
    %229 = arith.addf %223, %228 : vector<2x128xf32>
    %c0_196 = arith.constant 0 : index
    %c4_197 = arith.constant 4 : index
    %c0_198 = arith.constant 0 : index
    %c0_199 = arith.constant 0 : index
    %230 = vector.load %arg9[%c0_196, %c4_197, %c0_198, %c0_199] : memref<1x6x2x128xf32, #tpu.memory_space<vmem>>, vector<1x1x2x128xf32>
    %231 = vector.shape_cast %230 : vector<1x1x2x128xf32> to vector<2x128xf32>
    %232 = vector.shape_cast %229 : vector<2x128xf32> to vector<1x1x2x128xf32>
    tpu.vector_store %arg9[%c0_196, %c4_197, %c0_198, %c0_199], %232 {strides = array<i32>} : memref<1x6x2x128xf32, #tpu.memory_space<vmem>>, vector<1x1x2x128xf32>,
    %233 = arith.negf %229 : vector<2x128xf32>
    %234 = math.exp %233 : vector<2x128xf32>
    %cst_200 = arith.constant 1.000000e+00 : f32
    %235 = vector.broadcast %cst_200 : f32 to vector<2x128xf32>
    %236 = arith.addf %235, %234 : vector<2x128xf32>
    %237 = arith.divf %235, %236 : vector<2x128xf32>
    %c0_201 = arith.constant 0 : index
    %c0_202 = arith.constant 0 : index
    %c0_203 = arith.constant 0 : index
    %c0_204 = arith.constant 0 : index
    %238 = vector.load %arg12[%c0_201, %c0_202, %c0_203, %c0_204] : memref<1x1x2x128xf32, #tpu.memory_space<vmem>>, vector<1x1x2x128xf32>
    %239 = vector.shape_cast %238 : vector<1x1x2x128xf32> to vector<2x128xf32>
    %240 = vector.shape_cast %237 : vector<2x128xf32> to vector<1x1x2x128xf32>
    tpu.vector_store %arg12[%c0_201, %c0_202, %c0_203, %c0_204], %240 {strides = array<i32>} : memref<1x1x2x128xf32, #tpu.memory_space<vmem>>, vector<1x1x2x128xf32>,
    %c0_205 = arith.constant 0 : index
    %c2_206 = arith.constant 2 : index
    %241 = vector.load %arg15[%c0_205, %c2_206] : memref<1x8xf32, #tpu.memory_space<vmem>>, vector<1x1xf32>
    %c0_207 = arith.constant 0 : index
    %c0_208 = arith.constant 0 : index
    %c0_209 = arith.constant 0 : index
    %c0_210 = arith.constant 0 : index
    %242 = vector.load %arg7[%c0_207, %c0_208, %c0_209, %c0_210] : memref<1x1x2x128xf32, #tpu.memory_space<vmem>>, vector<1x1x2x128xf32>
    %243 = vector.shape_cast %242 : vector<1x1x2x128xf32> to vector<2x128xf32>
    %244 = arith.subf %237, %243 : vector<2x128xf32>
    %245 = math.absf %244 : vector<2x128xf32>
    %246 = arith.mulf %245, %4 : vector<2x128xf32>
    %cst_211 = arith.constant dense<0.000000e+00> : vector<2xf32>
    %247 = vector.multi_reduction <add>, %246, %cst_211 [1] : vector<2x128xf32> to vector<2xf32>
    %248 = vector.shape_cast %247 : vector<2xf32> to vector<2x1xf32>
    %cst_212 = arith.constant dense<0.000000e+00> : vector<1xf32>
    %249 = vector.multi_reduction <add>, %248, %cst_212 [0] : vector<2x1xf32> to vector<1xf32>
    %250 = vector.shape_cast %249 : vector<1xf32> to vector<1x1xf32>
    %251 = arith.addf %241, %250 : vector<1x1xf32>
    %c0_213 = arith.constant 0 : index
    %c2_214 = arith.constant 2 : index
    %252 = vector.load %arg15[%c0_213, %c2_214] : memref<1x8xf32, #tpu.memory_space<vmem>>, vector<1x1xf32>
    tpu.vector_store %arg15[%c0_213, %c2_214], %251 {strides = array<i32>} : memref<1x8xf32, #tpu.memory_space<vmem>>, vector<1x1xf32>,
    %c0_215 = arith.constant 0 : index
    %c5 = arith.constant 5 : index
    %253 = memref.load %arg4[%c0_215, %c5] : memref<1x6xf32, #tpu.memory_space<smem>>
    %c0_216 = arith.constant 0 : index
    %c5_217 = arith.constant 5 : index
    %254 = memref.load %arg3[%c0_216, %c5_217] : memref<4x6xf32, #tpu.memory_space<smem>>
    %c0_218 = arith.constant 0 : index
    %c0_219 = arith.constant 0 : index
    %c0_220 = arith.constant 0 : index
    %c0_221 = arith.constant 0 : index
    %255 = vector.load %arg2[%c0_218, %c0_219, %c0_220, %c0_221] : memref<1x4x2x128xf32, #tpu.memory_space<vmem>>, vector<1x1x2x128xf32>
    %256 = vector.shape_cast %255 : vector<1x1x2x128xf32> to vector<2x128xf32>
    %257 = vector.broadcast %254 : f32 to vector<2x128xf32>
    %258 = arith.mulf %257, %256 : vector<2x128xf32>
    %259 = vector.broadcast %253 : f32 to vector<2x128xf32>
    %260 = arith.addf %259, %258 : vector<2x128xf32>
    %c1_222 = arith.constant 1 : index
    %c5_223 = arith.constant 5 : index
    %261 = memref.load %arg3[%c1_222, %c5_223] : memref<4x6xf32, #tpu.memory_space<smem>>
    %c0_224 = arith.constant 0 : index
    %c1_225 = arith.constant 1 : index
    %c0_226 = arith.constant 0 : index
    %c0_227 = arith.constant 0 : index
    %262 = vector.load %arg2[%c0_224, %c1_225, %c0_226, %c0_227] : memref<1x4x2x128xf32, #tpu.memory_space<vmem>>, vector<1x1x2x128xf32>
    %263 = vector.shape_cast %262 : vector<1x1x2x128xf32> to vector<2x128xf32>
    %264 = vector.broadcast %261 : f32 to vector<2x128xf32>
    %265 = arith.mulf %264, %263 : vector<2x128xf32>
    %266 = arith.addf %260, %265 : vector<2x128xf32>
    %c2_228 = arith.constant 2 : index
    %c5_229 = arith.constant 5 : index
    %267 = memref.load %arg3[%c2_228, %c5_229] : memref<4x6xf32, #tpu.memory_space<smem>>
    %c0_230 = arith.constant 0 : index
    %c2_231 = arith.constant 2 : index
    %c0_232 = arith.constant 0 : index
    %c0_233 = arith.constant 0 : index
    %268 = vector.load %arg2[%c0_230, %c2_231, %c0_232, %c0_233] : memref<1x4x2x128xf32, #tpu.memory_space<vmem>>, vector<1x1x2x128xf32>
    %269 = vector.shape_cast %268 : vector<1x1x2x128xf32> to vector<2x128xf32>
    %270 = vector.broadcast %267 : f32 to vector<2x128xf32>
    %271 = arith.mulf %270, %269 : vector<2x128xf32>
    %272 = arith.addf %266, %271 : vector<2x128xf32>
    %c3_234 = arith.constant 3 : index
    %c5_235 = arith.constant 5 : index
    %273 = memref.load %arg3[%c3_234, %c5_235] : memref<4x6xf32, #tpu.memory_space<smem>>
    %c0_236 = arith.constant 0 : index
    %c3_237 = arith.constant 3 : index
    %c0_238 = arith.constant 0 : index
    %c0_239 = arith.constant 0 : index
    %274 = vector.load %arg2[%c0_236, %c3_237, %c0_238, %c0_239] : memref<1x4x2x128xf32, #tpu.memory_space<vmem>>, vector<1x1x2x128xf32>
    %275 = vector.shape_cast %274 : vector<1x1x2x128xf32> to vector<2x128xf32>
    %276 = vector.broadcast %273 : f32 to vector<2x128xf32>
    %277 = arith.mulf %276, %275 : vector<2x128xf32>
    %278 = arith.addf %272, %277 : vector<2x128xf32>
    %c0_240 = arith.constant 0 : index
    %c5_241 = arith.constant 5 : index
    %c0_242 = arith.constant 0 : index
    %c0_243 = arith.constant 0 : index
    %279 = vector.load %arg9[%c0_240, %c5_241, %c0_242, %c0_243] : memref<1x6x2x128xf32, #tpu.memory_space<vmem>>, vector<1x1x2x128xf32>
    %280 = vector.shape_cast %279 : vector<1x1x2x128xf32> to vector<2x128xf32>
    %281 = vector.shape_cast %278 : vector<2x128xf32> to vector<1x1x2x128xf32>
    tpu.vector_store %arg9[%c0_240, %c5_241, %c0_242, %c0_243], %281 {strides = array<i32>} : memref<1x6x2x128xf32, #tpu.memory_space<vmem>>, vector<1x1x2x128xf32>,
    %282 = arith.negf %278 : vector<2x128xf32>
    %283 = math.exp %282 : vector<2x128xf32>
    %cst_244 = arith.constant 1.000000e+00 : f32
    %284 = vector.broadcast %cst_244 : f32 to vector<2x128xf32>
    %285 = arith.addf %284, %283 : vector<2x128xf32>
    %286 = arith.divf %284, %285 : vector<2x128xf32>
    %c0_245 = arith.constant 0 : index
    %c0_246 = arith.constant 0 : index
    %c0_247 = arith.constant 0 : index
    %c0_248 = arith.constant 0 : index
    %287 = vector.load %arg13[%c0_245, %c0_246, %c0_247, %c0_248] : memref<1x1x2x128xf32, #tpu.memory_space<vmem>>, vector<1x1x2x128xf32>
    %288 = vector.shape_cast %287 : vector<1x1x2x128xf32> to vector<2x128xf32>
    %289 = vector.shape_cast %286 : vector<2x128xf32> to vector<1x1x2x128xf32>
    tpu.vector_store %arg13[%c0_245, %c0_246, %c0_247, %c0_248], %289 {strides = array<i32>} : memref<1x1x2x128xf32, #tpu.memory_space<vmem>>, vector<1x1x2x128xf32>,
    %c0_249 = arith.constant 0 : index
    %c3_250 = arith.constant 3 : index
    %290 = vector.load %arg15[%c0_249, %c3_250] : memref<1x8xf32, #tpu.memory_space<vmem>>, vector<1x1xf32>
    %c0_251 = arith.constant 0 : index
    %c0_252 = arith.constant 0 : index
    %c0_253 = arith.constant 0 : index
    %c0_254 = arith.constant 0 : index
    %291 = vector.load %arg8[%c0_251, %c0_252, %c0_253, %c0_254] : memref<1x1x2x128xf32, #tpu.memory_space<vmem>>, vector<1x1x2x128xf32>
    %292 = vector.shape_cast %291 : vector<1x1x2x128xf32> to vector<2x128xf32>
    %293 = arith.subf %286, %292 : vector<2x128xf32>
    %294 = math.absf %293 : vector<2x128xf32>
    %295 = arith.mulf %294, %4 : vector<2x128xf32>
    %cst_255 = arith.constant dense<0.000000e+00> : vector<2xf32>
    %296 = vector.multi_reduction <add>, %295, %cst_255 [1] : vector<2x128xf32> to vector<2xf32>
    %297 = vector.shape_cast %296 : vector<2xf32> to vector<2x1xf32>
    %cst_256 = arith.constant dense<0.000000e+00> : vector<1xf32>
    %298 = vector.multi_reduction <add>, %297, %cst_256 [0] : vector<2x1xf32> to vector<1xf32>
    %299 = vector.shape_cast %298 : vector<1xf32> to vector<1x1xf32>
    %300 = arith.addf %290, %299 : vector<1x1xf32>
    %c0_257 = arith.constant 0 : index
    %c3_258 = arith.constant 3 : index
    %301 = vector.load %arg15[%c0_257, %c3_258] : memref<1x8xf32, #tpu.memory_space<vmem>>, vector<1x1xf32>
    tpu.vector_store %arg15[%c0_257, %c3_258], %300 {strides = array<i32>} : memref<1x8xf32, #tpu.memory_space<vmem>>, vector<1x1xf32>,
    %c0_i32_259 = arith.constant 0 : i32
    %302 = arith.cmpi eq, %arg1, %c0_i32_259 : i32
    %303 = arith.extui %302 : i1 to i32
    %c0_i32_260 = arith.constant 0 : i32
    %304 = arith.cmpi ne, %303, %c0_i32_260 : i32
    scf.if %304 {
      %c0_261 = arith.constant 0 : index
      %c4_262 = arith.constant 4 : index
      %305 = vector.load %arg15[%c0_261, %c4_262] : memref<1x8xf32, #tpu.memory_space<vmem>>, vector<1x1xf32>
      %cst_263 = arith.constant 0.000000e+00 : f32
      %306 = vector.broadcast %cst_263 : f32 to vector<1x1xf32>
      %307 = arith.cmpf ogt, %305, %306 : vector<1x1xf32>
      %cst_264 = arith.constant 2.560000e+02 : f32
      %308 = vector.broadcast %cst_264 : f32 to vector<1x1xf32>
      %309 = arith.select %307, %305, %308 : vector<1x1xi1>, vector<1x1xf32>
      %cst_265 = arith.constant 1.000000e+00 : f32
      %310 = vector.broadcast %cst_265 : f32 to vector<1x1xf32>
      %311 = arith.divf %310, %309 : vector<1x1xf32>
      %c0_266 = arith.constant 0 : index
      %c0_267 = arith.constant 0 : index
      %312 = vector.load %arg15[%c0_266, %c0_267] : memref<1x8xf32, #tpu.memory_space<vmem>>, vector<1x1xf32>
      %cst_268 = arith.constant 3.125000e-02 : f32
      %313 = vector.broadcast %cst_268 : f32 to vector<1x1xf32>
      %314 = arith.mulf %312, %313 : vector<1x1xf32>
      %c0_269 = arith.constant 0 : index
      %c0_270 = arith.constant 0 : index
      %c0_271 = arith.constant 0 : index
      %315 = vector.load %arg14[%c0_269, %c0_270, %c0_271] : memref<1x1x4xf32, #tpu.memory_space<vmem>>, vector<1x1x1xf32>
      %316 = vector.shape_cast %315 : vector<1x1x1xf32> to vector<1x1xf32>
      %317 = vector.shape_cast %314 : vector<1x1xf32> to vector<1x1x1xf32>
      tpu.vector_store %arg14[%c0_269, %c0_270, %c0_271], %317 {strides = array<i32>} : memref<1x1x4xf32, #tpu.memory_space<vmem>>, vector<1x1x1xf32>,
      %c0_272 = arith.constant 0 : index
      %c1_273 = arith.constant 1 : index
      %318 = vector.load %arg15[%c0_272, %c1_273] : memref<1x8xf32, #tpu.memory_space<vmem>>, vector<1x1xf32>
      %319 = arith.mulf %318, %311 : vector<1x1xf32>
      %cst_274 = arith.constant 2.500000e-01 : f32
      %320 = vector.broadcast %cst_274 : f32 to vector<1x1xf32>
      %321 = arith.mulf %319, %320 : vector<1x1xf32>
      %c0_275 = arith.constant 0 : index
      %c0_276 = arith.constant 0 : index
      %c1_277 = arith.constant 1 : index
      %322 = vector.load %arg14[%c0_275, %c0_276, %c1_277] : memref<1x1x4xf32, #tpu.memory_space<vmem>>, vector<1x1x1xf32>
      %323 = vector.shape_cast %322 : vector<1x1x1xf32> to vector<1x1xf32>
      %324 = vector.shape_cast %321 : vector<1x1xf32> to vector<1x1x1xf32>
      tpu.vector_store %arg14[%c0_275, %c0_276, %c1_277], %324 {strides = array<i32>} : memref<1x1x4xf32, #tpu.memory_space<vmem>>, vector<1x1x1xf32>,
      %c0_278 = arith.constant 0 : index
      %c2_279 = arith.constant 2 : index
      %325 = vector.load %arg15[%c0_278, %c2_279] : memref<1x8xf32, #tpu.memory_space<vmem>>, vector<1x1xf32>
      %326 = arith.mulf %325, %311 : vector<1x1xf32>
      %cst_280 = arith.constant 1.000000e+00 : f32
      %327 = vector.broadcast %cst_280 : f32 to vector<1x1xf32>
      %328 = arith.mulf %326, %327 : vector<1x1xf32>
      %c0_281 = arith.constant 0 : index
      %c0_282 = arith.constant 0 : index
      %c2_283 = arith.constant 2 : index
      %329 = vector.load %arg14[%c0_281, %c0_282, %c2_283] : memref<1x1x4xf32, #tpu.memory_space<vmem>>, vector<1x1x1xf32>
      %330 = vector.shape_cast %329 : vector<1x1x1xf32> to vector<1x1xf32>
      %331 = vector.shape_cast %328 : vector<1x1xf32> to vector<1x1x1xf32>
      tpu.vector_store %arg14[%c0_281, %c0_282, %c2_283], %331 {strides = array<i32>} : memref<1x1x4xf32, #tpu.memory_space<vmem>>, vector<1x1x1xf32>,
      %c0_284 = arith.constant 0 : index
      %c3_285 = arith.constant 3 : index
      %332 = vector.load %arg15[%c0_284, %c3_285] : memref<1x8xf32, #tpu.memory_space<vmem>>, vector<1x1xf32>
      %333 = arith.mulf %332, %311 : vector<1x1xf32>
      %cst_286 = arith.constant 1.000000e+00 : f32
      %334 = vector.broadcast %cst_286 : f32 to vector<1x1xf32>
      %335 = arith.mulf %333, %334 : vector<1x1xf32>
      %c0_287 = arith.constant 0 : index
      %c0_288 = arith.constant 0 : index
      %c3_289 = arith.constant 3 : index
      %336 = vector.load %arg14[%c0_287, %c0_288, %c3_289] : memref<1x1x4xf32, #tpu.memory_space<vmem>>, vector<1x1x1xf32>
      %337 = vector.shape_cast %336 : vector<1x1x1xf32> to vector<1x1xf32>
      %338 = vector.shape_cast %335 : vector<1x1xf32> to vector<1x1x1xf32>
      tpu.vector_store %arg14[%c0_287, %c0_288, %c3_289], %338 {strides = array<i32>} : memref<1x1x4xf32, #tpu.memory_space<vmem>>, vector<1x1x1xf32>,
    } else {
    }
    return
  }
  func.func @transform_0(%arg0: i32, %arg1: i32) -> (i32, i32, i32, i32) {
    %c0_i32 = arith.constant 0 : i32
    %c0_i32_0 = arith.constant 0 : i32
    %c0_i32_1 = arith.constant 0 : i32
    return %arg0, %c0_i32, %arg1, %c0_i32_0 : i32, i32, i32, i32
  }
  func.func @transform_1(%arg0: i32, %arg1: i32) -> (i32, i32) {
    %c0_i32 = arith.constant 0 : i32
    %c0_i32_0 = arith.constant 0 : i32
    %c0_i32_1 = arith.constant 0 : i32
    return %c0_i32, %c0_i32_0 : i32, i32
  }
  func.func @transform_2(%arg0: i32, %arg1: i32) -> (i32, i32) {
    %c0_i32 = arith.constant 0 : i32
    %c0_i32_0 = arith.constant 0 : i32
    %c0_i32_1 = arith.constant 0 : i32
    return %c0_i32, %c0_i32_0 : i32, i32
  }
  func.func @transform_3(%arg0: i32, %arg1: i32) -> (i32, i32, i32, i32) {
    %c0_i32 = arith.constant 0 : i32
    %c0_i32_0 = arith.constant 0 : i32
    %c0_i32_1 = arith.constant 0 : i32
    return %arg0, %c0_i32, %arg1, %c0_i32_0 : i32, i32, i32, i32
  }
  func.func @transform_4(%arg0: i32, %arg1: i32) -> (i32, i32, i32, i32) {
    %c0_i32 = arith.constant 0 : i32
    %c0_i32_0 = arith.constant 0 : i32
    %c0_i32_1 = arith.constant 0 : i32
    return %arg0, %c0_i32, %arg1, %c0_i32_0 : i32, i32, i32, i32
  }
  func.func @transform_5(%arg0: i32, %arg1: i32) -> (i32, i32, i32, i32) {
    %c0_i32 = arith.constant 0 : i32
    %c0_i32_0 = arith.constant 0 : i32
    %c0_i32_1 = arith.constant 0 : i32
    return %arg0, %c0_i32, %arg1, %c0_i32_0 : i32, i32, i32, i32
  }
  func.func @transform_6(%arg0: i32, %arg1: i32) -> (i32, i32, i32, i32) {
    %c0_i32 = arith.constant 0 : i32
    %c0_i32_0 = arith.constant 0 : i32
    %c0_i32_1 = arith.constant 0 : i32
    return %arg0, %c0_i32, %arg1, %c0_i32_0 : i32, i32, i32, i32
  }
  func.func @transform_7(%arg0: i32, %arg1: i32) -> (i32, i32, i32, i32) {
    %c0_i32 = arith.constant 0 : i32
    %c0_i32_0 = arith.constant 0 : i32
    %c0_i32_1 = arith.constant 0 : i32
    return %arg0, %c0_i32, %arg1, %c0_i32_0 : i32, i32, i32, i32
  }
  func.func @transform_8(%arg0: i32, %arg1: i32) -> (i32, i32, i32, i32) {
    %c0_i32 = arith.constant 0 : i32
    %c0_i32_0 = arith.constant 0 : i32
    %c0_i32_1 = arith.constant 0 : i32
    return %arg0, %c0_i32, %arg1, %c0_i32_0 : i32, i32, i32, i32
  }
  func.func @transform_9(%arg0: i32, %arg1: i32) -> (i32, i32, i32, i32) {
    %c0_i32 = arith.constant 0 : i32
    %c0_i32_0 = arith.constant 0 : i32
    %c0_i32_1 = arith.constant 0 : i32
    return %arg0, %c0_i32, %arg1, %c0_i32_0 : i32, i32, i32, i32
  }
  func.func @transform_10(%arg0: i32, %arg1: i32) -> (i32, i32, i32, i32) {
    %c0_i32 = arith.constant 0 : i32
    %c0_i32_0 = arith.constant 0 : i32
    %c0_i32_1 = arith.constant 0 : i32
    return %arg0, %c0_i32, %arg1, %c0_i32_0 : i32, i32, i32, i32
  }
  func.func @transform_11(%arg0: i32, %arg1: i32) -> (i32, i32, i32, i32) {
    %c0_i32 = arith.constant 0 : i32
    %c0_i32_0 = arith.constant 0 : i32
    %c0_i32_1 = arith.constant 0 : i32
    return %arg0, %c0_i32, %arg1, %c0_i32_0 : i32, i32, i32, i32
  }
  func.func @transform_12(%arg0: i32, %arg1: i32) -> (i32, i32, i32) {
    %c0_i32 = arith.constant 0 : i32
    %c0_i32_0 = arith.constant 0 : i32
    %c0_i32_1 = arith.constant 0 : i32
    return %arg0, %c0_i32, %c0_i32_0 : i32, i32, i32
  }
}

</mosaic_0001>

<bundles_post_ra>
// kernel: tpu_custom_call.1
= control target key start
LH: loop header
LB: loop body
LE: loop exit
PB: predicated region body
PF: predicated region fallthrough
CT: control target
= control target key end

     0   :  { %s2664_s0 = inlined_call_operand.hbm [shape: f32[2,4,2,128], index: 0, kind: input, shape index: {}]   ;;  %s2665_s1 = inlined_call_operand.hbm [shape: f32[4,6], index: 1, kind: input, shape index: {}]   ;;  %s2666_s2 = inlined_call_operand.vmem [shape: f32[1,6], index: 2, kind: input, shape index: {}]   ;;  %s2667_s3 = inlined_call_operand.vmem [shape: f32[2,1,2,128], index: 3, kind: input, shape index: {}]   ;;  %s2668_s4 = inlined_call_operand.hbm [shape: f32[2,2,2,128], index: 4, kind: input, shape index: {}]   ;;  %s2669_s5 = inlined_call_operand.vmem [shape: f32[2,1,2,128], index: 5, kind: input, shape index: {}]   ;;  %s2670_s6 = inlined_call_operand.hbm [shape: f32[2,1,2,128], index: 6, kind: input, shape index: {}]   ;;  %s2671_s7 = inlined_call_operand.hbm [shape: f32[2,6,2,128], index: 7, kind: output, shape index: {0}]   ;;  %s2672_s8 = inlined_call_operand.hbm [shape: f32[2,1,2,128], index: 8, kind: output, shape index: {1}]   ;;  %s2673_s9 = inlined_call_operand.hbm [shape: f32[2,2,2,128], index: 9, kind: output, shape index: {2}]   ;;  %s2674_s10 = inlined_call_operand.hbm [shape: f32[2,1,2,128], index: 10, kind: output, shape index: {3}]   ;;  %s2675_s11 = inlined_call_operand.hbm [shape: f32[2,1,2,128], index: 11, kind: output, shape index: {4}]   ;;  %s2676_s12 = inlined_call_operand.hbm [shape: f32[2,1,4], index: 12, kind: output, shape index: {5}]  }
   0x1   :  { %2694 = sst [smem:[#allocation36_spill]] %s2664_s0 }
   0x2   :  { %2695 = sst [smem:[#allocation37_spill]] %s2665_s1 }
   0x3   :  { %2696 = sst [smem:[#allocation38_spill]] %s2666_s2 }
   0x4   :  { %2697 = sst [smem:[#allocation39_spill]] %s2667_s3 }
   0x5   :  { %2698 = sst [smem:[#allocation40_spill]] %s2668_s4 }
   0x6   :  { %2699 = sst [smem:[#allocation41_spill]] %s2669_s5 }
   0x7   :  { %2700 = sst [smem:[#allocation42_spill]] %s2671_s7 }
   0x8   :  { %2701 = sst [smem:[#allocation43_spill]] %s2673_s9 }
   0x9   :  { %2702 = sst [smem:[#allocation44_spill]] %s2675_s11 }
   0xa   :  { %2703 = sst [smem:[#allocation45_spill]] %s2676_s12 }
   0xb   :  { %18 = vsyncpa [#allocation4], 0 }
   0xc   :  { %20 = vsyncpa [#allocation4 + $0x1], 0 }
   0xd   :  { %21 = vsyncpa [#allocation6], 0 }
   0xe   :  { %22 = vsyncpa [#allocation7], 0 }
   0xf   :  { %23 = vsyncpa [#allocation11], 0 }
  0x10   :  { %25 = vsyncpa [#allocation11 + $0x1], 0 }
  0x11   :  { %26 = vsyncpa [#allocation5], 0 }
  0x12   :  { %28 = vsyncpa [#allocation5 + $0x1], 0 }
  0x13   :  { %29 = vsyncpa [#allocation15], 0 }
  0x14   :  { %31 = vsyncpa [#allocation15 + $0x1], 0 }
  0x15   :  { %32 = vsyncpa [#allocation18], 0 }
  0x16   :  { %34 = vsyncpa [#allocation18 + $0x1], 0 }
  0x17   :  { %35 = vsyncpa [#allocation21], 0 }
  0x18   :  { %37 = vsyncpa [#allocation21 + $0x1], 0  ;;  %s2127_s21 = smov 0   ;;  %s2129_s22 = smov 0  }
  0x19   :  { %s2131_s23 = smov 0   ;;  %s2133_s24 = smov 0  }
  0x1a   :  { %s2135_s25 = smov 0   ;;  %s2137_s26 = smov 0  }
  0x1b LB: > { %2704 = sst [smem:[#allocation30_spill]] %s2021_s21  ;;  %s55_s27 = sadd.s32 1, %s2037_s25  ;;  %s2041_s26 = sphi %s2137_s26, %s43_s26   ;;  %s2037_s25 = sphi %s2135_s25, %s2748_s25   ;;  %s2033_s24 = sphi %s2133_s24, %s2747_s24   ;;  %s2029_s23 = sphi %s2131_s23, %s2743_s23   ;;  %s2025_s22 = sphi %s2129_s22, %s2746_s22   ;;  %s2021_s21 = sphi %s2127_s21, %s2745_s21  }
  0x1c   : > { %2705 = sst [smem:[#allocation31_spill]] %s2029_s23  ;;  %s64_s28 = sadd.s32 1, %s2029_s23 }
  0x1d   : > { %2706 = sst [smem:[#allocation32_spill]] %s2041_s26  ;;  %p57_p0 = scmp.ge.s32.totalorder %s55_s27, 2 }
  0x1e   : > { %p71_p1 = scmp.ne.s32.totalorder %s2029_s23, %s2025_s22  ;;  %p72_p2 = scmp.eq.s32.totalorder %s2041_s26, 0 }
  0x1f   : > { %s2750_s27 = smov (%p57_p0, %s55_s27), 0  ;;  %p1609_p5 = scmp.lt.s32.totalorder %s2041_s26, 2 }
  0x20   : > { %2707 = sst [smem:[#allocation33_spill]] %s2750_s27  ;;  %p73_p4 = por %p72_p2, %p71_p1 }
  0x21   : > { %s59_s29 = ssub.s32 %s2037_s25, %s2750_s27  ;;  %s2172_s30 = sand.u32 1, %s2029_s23  }
  0x22   : > { %p62_p6 = scmp.eq.s32.totalorder %s59_s29, 0  ;;  %p2174_p7 = pnand %p1609_p5, %p73_p4 }
  0x23   : > { %s473_s15 = sand.u32 1, %s2041_s26   ;;  %s1453_s16 = sshll.u32 %s2172_s30, 2 }
  0x24   : > { %s2179_s14 = scalar_select %p62_p6, %s2029_s23, %s64_s28  }
  0x25   : > { %s1541_s17 = sshll.u32 %s2037_s25, 6  ;;  %s2710_s4 = sld [smem:[#allocation40_spill]] }
  0x26   : > { %2709 = sst [smem:[#allocation34_spill]] %s2179_s14  ;;  %s477_s27 = scalar_lea.vmem [#allocation10], %s1453_s16 }
  0x27   : > { %s485_s12 = sshll.u32 %s477_s27, 4  ;;  %s2187_s11 = scalar_lea.sflag [#allocation11], %s473_s15  ;;  %s486_s12 = int_to_ptr.vmem [resolvable:$true] %s485_s12 }
  0x28   : > { %p2690_p8 = pneg %p2174_p7  ;;  %s1710_s29 = scalar_lea.vmem %s486_s12, 64 }
  0x29   : > { %p1711_p9 = scmp.ne.s32.totalorder %s486_s12, %s1710_s29  ;;  %s2043_s28 = smov [#allocation10]  }
  0x2a   : > { %s1715_s14 = sshll.u32 %s2043_s28, 4  ;;  %s1716_s14 = int_to_ptr.vmem [resolvable:$false] %s1715_s14 }
  0x2b   : > { %s484_s20 = scalar_lea.hbm %s2710_s4, %s1541_s17  ;;  %p1713_p10 = pnand %p1711_p9, %p2690_p8 }
  0x2c   : > { %s1717_s9 = scalar_lea.vmem %s1716_s14, 128  ;;  %p1718_p12 = scmp.lt.s32.totalorder %s486_s12, %s1716_s14 }
  0x2d   : > { %p1714_p11 = pneg %p1713_p10  ;;  %p1719_p13 = scmp.lt.s32.totalorder %s1717_s9, %s1710_s29 }
  0x2f   : > { %p1720_p0 = por %p1719_p13, %p1718_p12 }
  0x31   : > { %p1721_p2 = pnand %p1720_p0, %p1714_p11 }
  0x33   : > { %1724 = shalt.err (!%p1721_p2)
}
  0x34   : > { %s2682_s27 = smov 32   ;;  %s2683_s15 = smov 2  }
  0x35   : > { %1584 = dma.hbm_to_vmem [thread:$0]  (!%p2174_p7), %s484_s20, 64, %s486_s12, %s2187_s11, %s2682_s27, %s2682_s27, %s2683_s15  }
  0x36   : > { %s2201_s9 = sadd.s32 4294967295, %s2041_s26   ;;  %s2681_s14 = sadd.s32 4294967294, %s2041_s26  }
  0x37   : > { %p77_p4 = scmp.ne.s32.totalorder %s2025_s22, %s2021_s21  ;;  %p2689_p5 = scmp.eq.s32.totalorder %s2201_s9, 0 }
  0x38   : > { %p257_p6 = scmp.eq.s32.totalorder %s2201_s9, 1  ;;  %p263_p9 = scmp.eq.s32.totalorder %s2681_s14, 1 }
  0x39   : > { %p1446_p10 = scmp.ge.s32.totalorder %s2041_s26, 1  ;;  %p2213_p11 = por %p2689_p5, %p77_p4 }
  0x3a   : > { %p2220_p12 = por %p257_p6, %p71_p1  ;;  %p2224_p13 = por %p263_p9, %p77_p4 }
  0x3b   : > { %p408_p0 = scmp.lt.s32.totalorder %s2041_s26, 3  ;;  %s2716_s2 = sld [smem:[#allocation38_spill]] }
  0x3c   : > { %s2713_s17 = scalar_select %p2224_p13, 1, 0 }
  0x3d   : > { %p2229_p2 = pnand %p1446_p10, %p408_p0  ;;  %s1450_s28 = sshll.u32 %s2172_s30, 3 }
  0x3e   : > { %2714 = sst [smem:[#allocation35_spill]] %s2713_s17  ;;  %s1540_s14 = sshll.u32 %s2037_s25, 7 }
  0x3f   : > { %p1571_p1 = pneg %p2229_p2  ;;  %s2718_s0 = sld [smem:[#allocation36_spill]] }
  0x40   : > { %s445_s19 = scalar_lea.vmem [#allocation3], %s1450_s28  ;;  %s2719_s1 = sld [smem:[#allocation37_spill]] }
  0x41   : > { %s430_s29 = sshll.u32 %s2716_s2, 4  ;;  %p2242_p4 = pnand %p1571_p1, %p2689_p5  ;;  %s431_s29 = int_to_ptr.vmem [resolvable:$true] %s430_s29 }
  0x42   : > { %s453_s20 = sshll.u32 %s445_s19, 4  ;;  %s2046_s2 = smov [#allocation8]   ;;  %s2251_s20 = int_to_ptr.vmem [resolvable:$true] %s453_s20 }
  0x43   : > { %s1736_s21 = scalar_lea.vmem %s431_s29, 16  ;;  %p1738_p9 = pneg %p2242_p4 }
  0x44   : > { %p1737_p6 = scmp.ne.s32.totalorder %s431_s29, %s1736_s21  ;;  %p1744_p1 = scmp.lt.s32.totalorder %s431_s29, %s431_s29 }
  0x45   : > { %s2249_s23 = scalar_lea.hbm %s2718_s0, %s1540_s14  ;;  %p1745_p3 = scmp.lt.s32.totalorder %s1736_s21, %s1736_s21 }
  0x46   : > { %1574 = dma.hbm_to_smem (!%p2242_p4), %s2719_s1, 64, %s2046_s2, [#allocation6]  }
  0x47   : > { %p1739_p10 = pnand %p1738_p9, %p1737_p6  ;;  %p1746_p5 = por %p1745_p3, %p1744_p1 }
  0x49   : > { %p1740_p0 = pneg %p1739_p10 }
  0x4b   : > { %p1747_p8 = pnand %p1746_p5, %p1740_p0 }
  0x4d   : > { %1750 = shalt.err (!%p1747_p8)
}
  0x4e   : > { %s2047_s4 = smov [#allocation9]   ;;  %s442_s2 = scalar_lea.sflag [#allocation4], %s2172_s30 }
  0x4f   : > { %1577 = dma.vmem_to_smem (!%p2242_p4), %s431_s29, 16, %s2047_s4, [#allocation7]  }
  0x50   : > { %s1764_s26 = scalar_lea.vmem %s2251_s20, 128  ;;  %p2720_p6 = pneg %p2174_p7 }
  0x51   : > { %p1765_p13 = scmp.ne.s32.totalorder %s2251_s20, %s1764_s26  ;;  %s2048_s21 = smov [#allocation3]  }
  0x52   : > { %s1769_s15 = sshll.u32 %s2048_s21, 4  ;;  %s1770_s15 = int_to_ptr.vmem [resolvable:$false] %s1769_s15 }
  0x53   : > { %p1767_p9 = pnand %p1765_p13, %p2720_p6  ;;  %s1771_s14 = scalar_lea.vmem %s1770_s15, 256 }
  0x54   : > { %p1772_p3 = scmp.lt.s32.totalorder %s2251_s20, %s1770_s15  ;;  %p1773_p8 = scmp.lt.s32.totalorder %s1771_s14, %s1764_s26 }
  0x55   : > { %p1768_p10 = pneg %p1767_p9 }
  0x56   : > { %p1774_p5 = por %p1773_p8, %p1772_p3 }
  0x58   : > { %p1775_p0 = pnand %p1774_p5, %p1768_p10 }
  0x5a   : > { %1778 = shalt.err (!%p1775_p0)
}
  0x5b   : > { %s2721_s27 = smov 2   ;;  %s2722_s17 = smov 32  }
  0x5c   : > { %1581 = dma.hbm_to_vmem [thread:$0]  (!%p2174_p7), %s2249_s23, 128, %s2251_s20, %s442_s2, %s2722_s17, %s2722_s17, %s2721_s27  }
  0x5d   : > { %s1456_s29 = sshll.u32 %s2172_s30, 1  ;;  %s1457_s28 = sshll.u32 %s2037_s25, 5 }
  0x5e   : > { %s515_s26 = scalar_lea.hbm %s2670_s6, %s1457_s28  ;;  %s509_s21 = scalar_lea.vmem [#allocation12], %s1456_s29 }
  0x5f   : > { %s517_s15 = sshll.u32 %s509_s21, 4  ;;  %p2723_p4 = pmov %p2720_p6  ;;  %s518_s15 = int_to_ptr.vmem [resolvable:$true] %s517_s15 }
  0x60   : > { %s1792_s14 = scalar_lea.vmem %s518_s15, 32  ;;  %s2049_s0 = smov [#allocation12]  }
  0x61   : > { %p1793_p13 = scmp.ne.s32.totalorder %s518_s15, %s1792_s14  ;;  %s1797_s1 = sshll.u32 %s2049_s0, 4  ;;  %s1798_s1 = int_to_ptr.vmem [resolvable:$false] %s1797_s1 }
  0x62   : > { %s1799_s7 = scalar_lea.vmem %s1798_s1, 64  ;;  %p1800_p9 = scmp.lt.s32.totalorder %s518_s15, %s1798_s1 }
  0x63   : > { %p1795_p1 = pnand %p1793_p13, %p2723_p4  ;;  %p1801_p10 = scmp.lt.s32.totalorder %s1799_s7, %s1792_s14 }
  0x65   : > { %p1796_p6 = pneg %p1795_p1  ;;  %p1802_p3 = por %p1801_p10, %p1800_p9 }
  0x67   : > { %p1803_p8 = pnand %p1802_p3, %p1796_p6 }
  0x69   : > { %1806 = shalt.err (!%p1803_p8)
}
  0x6a   : > { %1587 = dma.hbm_to_vmem [thread:$0]  (!%p2174_p7), %s515_s26, 32, %s518_s15, %s2187_s11  }
  0x6b   : > { %526 = sbr.rel (%p2229_p2) target bundleno = 593 (0x251), region = 48  ;;  %s2290_s23 = sand.u32 (!%p2229_p2), 1, %s2025_s22  }
  0x6c   : > { %s1459_s0 = sshll.u32 (!%p2229_p2), %s2290_s23, 3  ;;  %s529_s30 = scalar_lea.sflag (!%p2229_p2), [#allocation4], %s2290_s23 }
  0x6d   : > { %s2294_s1 = scalar_lea.vmem (!%p2229_p2), [#allocation3], %s1459_s0 }
  0x70   : > { %1988 = dma.done.wait (%p2213_p11), %s529_s30, 128  }
  0x71   : > { %1990 = vsyncadd (%p2213_p11), %s529_s30, 4294967168  ;;  %p2724_p7 = scmp.eq.s32.totalorder %s2201_s9, 0 }
  0x73   : > { %1992 = dma.done.wait (%p2724_p7), [#allocation6], 64   ;;  %p2725_p2 = pmov %p2724_p7 }
  0x75   : > { %1994 = vsyncadd (%p2725_p2), [#allocation6], 4294967232  ;;  %p2726_p5 = pmov %p2725_p2 }
  0x76   : > { %p2727_p0 = pmov %p2725_p2 }
  0x77   : > { %1996 = dma.done.wait (%p2726_p5), [#allocation7], 16  }
  0x78   : > { %1998 = vsyncadd (%p2727_p0), [#allocation7], 4294967280  ;;  %s2309_s7 = sand.u32 1, %s2201_s9   ;;  %s1462_s11 = sshll.u32 %s2290_s23, 2 }
  0x79   : > { %s546_s13 = scalar_lea.sflag [#allocation11], %s2309_s7  ;;  %s2315_s18 = scalar_lea.vmem [#allocation10], %s1462_s11 }
  0x7a   : > { %2000 = dma.done.wait (%p2213_p11), %s546_s13, 96  }
  0x7b   : > { %2002 = vsyncadd (%p2213_p11), %s546_s13, 4294967200  ;;  %s2322_s20 = sshll.u32 %s2290_s23, 1 }
  0x7c   : > { %s558_s2 = scalar_lea.vmem [#allocation12], %s2322_s20 }
  0x7d   : > { %563 = sfence }
  0x7e   : > { %p648_p13 = scmp.lt.s32.totalorder %s2033_s24, 1  ;;  %s1483_s9 = sld [smem:[#allocation9 + $0x2]]  ;;  %vm666_vm0 = vcmask 57344   ;;  %vm670_vm1 = vcmask 1041408   ;;  %v2050_v0 = vmov 0.0   ;;  %vm682_vm2 = vcmask 32800  }
  0x7f   : > { %s1484_s27 = sld [smem:[#allocation8 + $0x2]]  ;;  %667 = vst.msk [vmem:[#allocation2] sm:$0x1] %vm666_vm0, %v2050_v0  ;;  %v767_v1 = vld [vmem:[%s2294_s1] sm:$0x3]  ;;  %s1543_s13 = smul.u32 12, %s2290_s23 }
  0x80   : > { %s2327_s17 = scalar_select %p648_p13, %s2033_s24, 1  ;;  %v1486_v6 = vld [vmem:[%s2294_s1 + $0x2] sm:$0x3]  ;;  %v1488_v8 = vld [vmem:[%s2294_s1 + $0x4] sm:$0x3]  ;;  %vm763_vm3 = vcmask 0  }
  0x81   : > { %s1485_s16 = sld [smem:[#allocation8 + $0x82]]  ;;  %v1490_v10 = vld [vmem:[%s2294_s1 + $0x6] sm:$0x3]  ;;  %v814_v18 = vld [vmem:[%s2294_s1] sm:$0x3]  ;;  %vm863_vm4 = vcmask 8200  }
  0x82   : > { %s1468_s29 = sshll.u32 %s2327_s17, 1  ;;  %s1487_s28 = sld [smem:[#allocation8 + $0x102]]  ;;  %v1497_v19 = vld [vmem:[%s2294_s1 + $0x2] sm:$0x3]  ;;  %v1499_v23 = vld [vmem:[%s2294_s1 + $0x4] sm:$0x3] }
  0x83   : > { %s2728_s3 = sld [smem:[#allocation39_spill]]  ;;  %v1501_v29 = vld [vmem:[%s2294_s1 + $0x6] sm:$0x3]  ;;  %v686_v33 = vld [vmem:[%s2294_s1] sm:$0x3]  ;;  %vm912_vm5 = vcmask 16400  }
  0x84   : > { %s1489_s21 = sld [smem:[#allocation8 + $0x182]]  ;;  %v770_v5 = vstv %s1483_s9  ;;  %v1471_v35 = vld [vmem:[%s2294_s1 + $0x2] sm:$0x3]  ;;  %v1473_v40 = vld [vmem:[%s2294_s1 + $0x4] sm:$0x3]  ;;  %vm961_vm6 = vcmask 24600  }
  0x85   : > { %v768_v4 = vstv %s1484_s27  ;;  %s2341_s15 = sld [smem:[#allocation9 + $0x3]]  ;;  %v1475_v46 = vld [vmem:[%s2294_s1 + $0x6] sm:$0x3]  ;;  %v867_v0 = vld [vmem:[%s2294_s1] sm:$0x3]  ;;  %s2459_s17 = scalar_lea.vmem [#allocation20], %s2290_s23 }
  0x86   : > { %v769_v7 = vmul.f32 %v768_v4, %v767_v1  ;;  %s1495_s14 = sld [smem:[#allocation8 + $0x3]] }
  0x87   : > { %v774_v9 = vstv %s1485_s16  ;;  %s1496_s0 = sld [smem:[#allocation8 + $0x83]] }
  0x88   : > { %v771_v11 = vadd.f32 %v770_v5, %v769_v7  ;;  %v775_v12 = vmul.f32 %v1486_v6, %v774_v9  ;;  %v779_v13 = vstv %s1487_s28  ;;  %s1498_s30 = sld [smem:[#allocation8 + $0x103]] }
  0x89   : > { %s654_s26 = scalar_lea.vmem %s2728_s3, %s1468_s29  ;;  %v780_v14 = vmul.f32 %v1488_v8, %v779_v13  ;;  %s2346_s9 = sld [smem:[#allocation8 + $0x183]]  ;;  %v1512_v8 = vld [vmem:[%s2294_s1 + $0x4] sm:$0x3] }
  0x8a   : > { %v2336_v2 = vld [vmem:[%s654_s26] sm:$0x3]  ;;  %v784_v15 = vstv %s1489_s21  ;;  %v776_v16 = vadd.f32 %v775_v12, %v771_v11  ;;  %s2349_s27 = sld [smem:[#allocation9]]  ;;  %s2365_s21 = scalar_lea.vmem [#allocation13], %s1543_s13 }
  0x8b   : > { %v671_v3 = vsel %vm670_vm1, %v2336_v2, 0.0  ;;  %v785_v17 = vmul.f32 %v1490_v10, %v784_v15  ;;  %s2352_s16 = sld [smem:[#allocation8]]  ;;  %v817_v22 = vstv %s2341_s15 }
  0x8c   : > { %672 = vadd.xlane.f32.xlu0 %v671_v3  ;;  %v781_v20 = vadd.f32 %v780_v14, %v776_v16  ;;  %v815_v21 = vstv %s1495_s14  ;;  %s1470_s28 = sld [smem:[#allocation8 + $0x80]]  ;;  %v1510_v3 = vld [vmem:[%s2294_s1 + $0x2] sm:$0x3]  ;;  %v1514_v14 = vld [vmem:[%s2294_s1 + $0x6] sm:$0x3] }
  0x8d   : > { %v816_v24 = vmul.f32 %v815_v21, %v814_v18  ;;  %v821_v25 = vstv %s1496_s0  ;;  %s2356_s19 = sld [smem:[#allocation8 + $0x100]]  ;;  %v916_v18 = vld [vmem:[%s2294_s1] sm:$0x3]  ;;  %v1520_v21 = vld [vmem:[%s2294_s1 + $0x2] sm:$0x3] }
  0x8e   : > { %v786_v26 = vadd.f32 %v785_v17, %v781_v20  ;;  %v822_v27 = vmul.f32 %v1497_v19, %v821_v25  ;;  %v826_v28 = vstv %s1498_s30  ;;  %s2359_s4 = sld [smem:[#allocation8 + $0x180]] }
  0x8f   : > { %v818_v30 = vadd.f32 %v817_v22, %v816_v24  ;;  %v827_v31 = vmul.f32 %v1499_v23, %v826_v28  ;;  %v831_v32 = vstv %s2346_s9  ;;  %s2363_s26 = sld [smem:[#allocation9 + $0x1]] }
  0x90   : > { %v1492_v34 = vmul.f32 -1.442695, %v786_v26  ;;  %1491 = vst [vmem:[%s2365_s21 + $0x4] sm:$0x3] %v786_v26  ;;  %s1477_s15 = sld [smem:[#allocation8 + $0x1]]  ;;  %v832_v37 = vmul.f32 %v1501_v29, %v831_v32  ;;  %v689_v39 = vstv %s2349_s27 }
  0x91   : > { %v823_v36 = vadd.f32 %v822_v27, %v818_v30  ;;  %v687_v38 = vstv %s2352_s16  ;;  %s1478_s14 = sld [smem:[#allocation8 + $0x81]]  ;;  %v1522_v30 = vld [vmem:[%s2294_s1 + $0x4] sm:$0x3] }
  0x92   : > { %1671 = vpow2.f32 %v1492_v34  ;;  %v688_v41 = vmul.f32 %v687_v38, %v686_v33  ;;  %v694_v42 = vstv %s1470_s28  ;;  %s1479_s0 = sld [smem:[#allocation8 + $0x101]] }
  0x93   : > { %v828_v43 = vadd.f32 %v827_v31, %v823_v36  ;;  %v695_v44 = vmul.f32 %v1471_v35, %v694_v42  ;;  %v700_v45 = vstv %s2356_s19  ;;  %s2374_s30 = sld [smem:[#allocation8 + $0x181]] }
  0x94   : > { %v690_v47 = vadd.f32 %v689_v39, %v688_v41  ;;  %v701_v48 = vmul.f32 %v1473_v40, %v700_v45  ;;  %v706_v49 = vstv %s2359_s4  ;;  %s2377_s13 = sld [smem:[#allocation9 + $0x4]] }
  0x95   : > { %v833_v50 = vadd.f32 %v832_v37, %v828_v43  ;;  %s2379_s9 = sld [smem:[#allocation8 + $0x4]]  ;;  %v707_v52 = vmul.f32 %v1475_v46, %v706_v49  ;;  %v713_v54 = vstv %s2363_s26 }
  0x96   : > { %v696_v51 = vadd.f32 %v695_v44, %v690_v47  ;;  %v711_v53 = vstv %s1477_s15  ;;  %s1509_s27 = sld [smem:[#allocation8 + $0x84]] }
  0x97   : > { %v1503_v55 = vmul.f32 -1.442695, %v833_v50  ;;  %1502 = vst [vmem:[%s2365_s21 + $0x6] sm:$0x3] %v833_v50  ;;  %v712_v56 = vmul.f32 %v711_v53, %v686_v33  ;;  %v716_v57 = vstv %s1478_s14  ;;  %s1511_s16 = sld [smem:[#allocation8 + $0x104]] }
  0x98   : > { %v702_v58 = vadd.f32 %v701_v48, %v696_v51  ;;  %v717_v59 = vmul.f32 %v1471_v35, %v716_v57  ;;  %v720_v60 = vstv %s1479_s0  ;;  %s2383_s28 = sld [smem:[#allocation8 + $0x184]]  ;;  %v1524_v35 = vld [vmem:[%s2294_s1 + $0x6] sm:$0x3]  ;;  %v797_v51 = vld [vmem:[%s2315_s18] sm:$0x3]  ;;  %s2416_s1 = scalar_lea.vmem [#allocation16], %s1462_s11 }
  0x99   : > { %1673 = vpow2.f32 %v1503_v55  ;;  %v714_v61 = vadd.f32 %v713_v54, %v712_v56  ;;  %v721_v62 = vmul.f32 %v1473_v40, %v720_v60  ;;  %v724_v63 = vstv %s2374_s30  ;;  %s2387_s19 = sld [smem:[#allocation9 + $0x5]]  ;;  %s620_s30 = scalar_lea.vmem [#allocation14], %s2322_s20 }
  0x9a   : > { %v708_v1 = vadd.f32 %v707_v52, %v702_v58  ;;  %s1518_s4 = sld [smem:[#allocation8 + $0x5]]  ;;  %v725_v5 = vmul.f32 %v1475_v46, %v724_v63  ;;  %v870_v7 = vstv %s2377_s13  ;;  %v1506_v58 = vld [vmem:[%s2315_s18 + $0x2] sm:$0x3]  ;;  %s1049_s13 = sshll.u32 %s620_s30, 4  ;;  %s1050_s13 = int_to_ptr.vmem [resolvable:$true] %s1049_s13 }
  0x9b   : > { %v718_v4 = vadd.f32 %v717_v59, %v714_v61  ;;  %v868_v6 = vstv %s2379_s9  ;;  %s1519_s26 = sld [smem:[#allocation8 + $0x85]]  ;;  %s634_s9 = scalar_lea.vmem [#allocation17], %s2322_s20 }
  0x9c   : > { %727 = vst [vmem:[%s2365_s21] sm:$0x3] %v708_v1  ;;  %v869_v9 = vmul.f32 %v868_v6, %v867_v0  ;;  %v874_v10 = vstv %s1509_s27  ;;  %s2394_s15 = sld [smem:[#allocation8 + $0x105]] }
  0x9d   : > { %v722_v11 = vadd.f32 %v721_v62, %v718_v4  ;;  %v875_v12 = vmul.f32 %v1510_v3, %v874_v10  ;;  %v879_v13 = vstv %s1511_s16  ;;  %s2397_s14 = sld [smem:[#allocation8 + $0x185]] }
  0x9e   : > { %v871_v15 = vadd.f32 %v870_v7, %v869_v9  ;;  %v880_v16 = vmul.f32 %v1512_v8, %v879_v13  ;;  %v884_v17 = vstv %s2383_s28  ;;  %s2729_s5 = sld [smem:[#allocation41_spill]]  ;;  %v748_v9 = vsub.f32 1.0, %v2336_v2 }
  0x9f   : > { %v1672_v19 = vpop.eup %1671  ;;  %v726_v20 = vadd.f32 %v725_v5, %v722_v11  ;;  %v885_v24 = vmul.f32 %v1514_v14, %v884_v17  ;;  %v919_v28 = vstv %s2387_s19  ;;  %v946_v17 = vld [vmem:[%s558_s2] sm:$0x3]  ;;  %s1063_s2 = sshll.u32 %s2416_s1, 4  ;;  %s2693_s19 = scalar_lea.sflag [#allocation15], %s2309_s7  ;;  %s2463_s2 = int_to_ptr.vmem [resolvable:$true] %s1063_s2 }
  0xa0   : > { %v792_v22 = vadd.f32 1.0, %v1672_v19  ;;  %v876_v23 = vadd.f32 %v875_v12, %v871_v15  ;;  %v917_v25 = vstv %s1518_s4  ;;  %s1807_s4 = scalar_lea.vmem %s1050_s13, 32 }
  0xa1   : > { %v2402_v26 = vsub.f32 %v726_v20, %v708_v1  ;;  %1481 = vst [vmem:[%s2365_s21 + $0x2] sm:$0x3] %v726_v20  ;;  %v918_v27 = vmul.f32 %v917_v25, %v916_v18  ;;  %v923_v29 = vstv %s1519_s26  ;;  %p1808_p11 = scmp.ne.s32.totalorder %s1050_s13, %s1807_s4  ;;  %s2051_s26 = smov [#allocation14]  }
  0xa2   : > { %1675 = vrcp.f32 %v792_v22  ;;  %v881_v31 = vadd.f32 %v880_v16, %v876_v23  ;;  %v924_v32 = vmul.f32 %v1520_v21, %v923_v29  ;;  %v928_v33 = vstv %s2394_s15  ;;  %s1811_s15 = sshll.u32 %s2051_s26, 4  ;;  %s1812_s15 = int_to_ptr.vmem [resolvable:$false] %s1811_s15 }
  0xa3   : > { %v740_v34 = vand.u32 2147483647, %v2402_v26  ;;  %v920_v37 = vadd.f32 %v919_v28, %v918_v27  ;;  %v929_v38 = vmul.f32 %v1522_v30, %v928_v33  ;;  %v933_v39 = vstv %s2397_s14  ;;  %p1809_p4 = pnand %p1808_p11, %p2220_p12  ;;  %s1813_s14 = scalar_lea.vmem %s1812_s15, 64 }
  0xa4   : > { %v886_v36 = vadd.f32 %v885_v24, %v881_v31  ;;  %v934_v44 = vmul.f32 %v1524_v35, %v933_v39  ;;  %s661_s0 = scalar_lea.vmem %s2729_s5, %s1468_s29  ;;  %v738_v7 = vsub.f32 0.0, %v2402_v26  ;;  %v749_v15 = vmul.f32 %v748_v9, %v2402_v26  ;;  %s2466_s29 = sshll.u32 %s2033_s24, 5 }
  0xa5   : > { %v741_v40 = vsub.f32 0.0, %v740_v34  ;;  %v925_v43 = vadd.f32 %v924_v32, %v920_v37  ;;  %v897_v8 = vld [vmem:[%s661_s0] sm:$0x3]  ;;  %s1047_s28 = scalar_lea.hbm %s2672_s8, %s2466_s29  ;;  %p1810_p1 = pneg %p1809_p4 }
  0xa6   : > { %v1674_v41 = vpop.eup %1673  ;;  %v1516_v42 = vmul.f32 -1.442695, %v886_v36  ;;  %1515 = vst [vmem:[%s2365_s21 + $0x8] sm:$0x3] %v886_v36  ;;  %v739_v11 = vmax.f32 %v738_v7, 0.0  ;;  %p1814_p6 = scmp.lt.s32.totalorder %s1050_s13, %s1812_s15  ;;  %p1815_p9 = scmp.lt.s32.totalorder %s1813_s14, %s1807_s4 }
  0xa7   : > { %v839_v45 = vadd.f32 1.0, %v1674_v41  ;;  %v742_v46 = vmul.f32 1.442695, %v741_v40  ;;  %v930_v47 = vadd.f32 %v929_v38, %v925_v43  ;;  %v669_v36 = vld [vmem:[#allocation2] sm:$0x1] }
  0xa8   : > { %1677 = vpow2.f32 %v1516_v42  ;;  %p1816_p10 = por %p1815_p9, %p1814_p6 }
  0xa9   : > { %1679 = vrcp.f32 %v839_v45  ;;  %v935_v48 = vadd.f32 %v934_v44, %v930_v47 }
  0xaa   : > { %1681 = vpow2.f32 %v742_v46  ;;  %p1817_p3 = pnand %p1816_p10, %p1810_p1 }
  0xab   : > { %v1526_v49 = vmul.f32 -1.442695, %v935_v48  ;;  %1525 = vst [vmem:[%s2365_s21 + $0xa] sm:$0x3] %v935_v48 }
  0xad   : > { %1683 = vpow2.f32 %v1526_v49 }
  0xaf   : > { %v1676_v50 = vpop.eup %1675 }
  0xb0   : > { %v1493_v52 = vadd.f32 -0.5, %v1676_v50 }
  0xb2   : > { %v798_v53 = vsub.f32 %v1493_v52, %v797_v51  ;;  %796 = vst [vmem:[%s2416_s1] sm:$0x3] %v1493_v52 }
  0xb4   : > { %v799_v54 = vand.u32 2147483647, %v798_v53 }
  0xb5   : > { %v1678_v55 = vpop.eup %1677 }
  0xb6   : > { %v1680_v56 = vpop.eup %1679  ;;  %v800_v57 = vmul.f32 %v799_v54, %v2336_v2  ;;  %v892_v59 = vadd.f32 1.0, %v1678_v55 }
  0xb7   : > { %v1682_v60 = vpop.eup %1681  ;;  %v1504_v61 = vadd.f32 -0.5, %v1680_v56 }
  0xb8   : > { %v801_v62 = vsel %vm670_vm1, %v800_v57, 0.0  ;;  %v744_v63 = vadd.f32 1.0, %v1682_v60  ;;  %1685 = vrcp.f32 %v892_v59 }
  0xb9   : > { %802 = vadd.xlane.f32.xlu1 %v801_v62  ;;  %v847_v0 = vsub.f32 %v1504_v61, %v1506_v58  ;;  %1505 = vst [vmem:[%s2416_s1 + $0x2] sm:$0x3] %v1504_v61 }
  0xba   : > { %1687 = vlog2.f32 %v744_v63  ;;  %v1684_v1 = vpop.eup %1683 }
  0xbb   : > { %v848_v3 = vand.u32 2147483647, %v847_v0  ;;  %v941_v4 = vadd.f32 1.0, %v1684_v1 }
  0xbd   : > { %v849_v5 = vmul.f32 %v848_v3, %v2336_v2  ;;  %1689 = vrcp.f32 %v941_v4 }
  0xbf   : > { %v850_v6 = vsel %vm670_vm1, %v849_v5, 0.0 }
  0xc0   : > { %851 = vadd.xlane.f32.xlu1 %v850_v6 }
  0xc5   : > { %v2432_v10 = vpop.eup %1685 }
  0xc6   : > { %v898_v12 = vsub.f32 %v2432_v10, %v897_v8  ;;  %895 = vst [vmem:[%s634_s9] sm:$0x3] %v2432_v10 }
  0xc7   : > { %v1688_v13 = vpop.eup %1687 }
  0xc8   : > { %v746_v14 = vmul.f32 0.6931472, %v1688_v13  ;;  %v899_v16 = vand.u32 2147483647, %v898_v12 }
  0xca   : > { %v747_v18 = vadd.f32 %v746_v14, %v739_v11  ;;  %v2438_v19 = vpop.eup %1689  ;;  %v900_v21 = vmul.f32 %v899_v16, %v2336_v2 }
  0xcb   : > { %v947_v22 = vsub.f32 %v2438_v19, %v946_v17 }
  0xcc   : > { %v750_v20 = vadd.f32 %v749_v15, %v747_v18  ;;  %v901_v25 = vsel %vm670_vm1, %v900_v21, 0.0  ;;  %v1482_v15 = vmul.f32 -1.442695, %v2402_v26 }
  0xcd   : > { %v948_v24 = vand.u32 2147483647, %v947_v22 }
  0xce   : > { %v752_v23 = vsel %vm670_vm1, %v750_v20, 0.0  ;;  %1691 = vpow2.f32 %v1482_v15 }
  0xcf   : > { %753 = vadd.xlane.f32.xlu0 %v752_v23  ;;  %v949_v27 = vmul.f32 %v948_v24, %v2336_v2 }
  0xd1   : > { %v950_v28 = vsel %vm670_vm1, %v949_v27, 0.0 }
  0xd2   : > { %951 = vadd.xlane.f32.xlu1 %v950_v28 }
  0xd3   : > { %902 = vadd.xlane.f32.xlu0 %v901_v25 }
  0xdb   : > { %v1692_v27 = vpop.eup %1691 }
  0xdc   : > { %v734_v28 = vadd.f32 1.0, %v1692_v27 }
  0xde   : > { %1693 = vrcp.f32 %v734_v28 }
 0x115   : > { %v673_v29 = vpop.xlane.xlu0 %672 }
 0x116   : > { %v674_v30 = vsel %vm670_vm1, %v673_v29, 0.0 }
 0x117   : > { %v675_v31 = vrot.slane %v674_v30, 4 }
 0x119   : > { %v676_v32 = vadd.f32 %v675_v31, %v674_v30 }
 0x11b   : > { %v677_v33 = vrot.slane %v676_v32, 2 }
 0x11d   : > { %v678_v34 = vadd.f32 %v677_v33, %v676_v32  ;;  %v1694_v32 = vpop.eup %1693 }
 0x11e   : > { %737 = vst [vmem:[%s620_s30] sm:$0x3] %v1694_v32 }
 0x11f   : > { %v679_v35 = vrot.slane %v678_v34, 1 }
 0x121   : > { %v680_v37 = vadd.f32 %v679_v35, %v678_v34 }
 0x123   : > { %v681_v38 = vadd.f32 %v680_v37, %v669_v36 }
 0x125   : > { %683 = vst.msk [vmem:[#allocation2] sm:$0x1] %vm682_vm2, %v681_v38 }
 0x12c   : > { %v751_v61 = vld [vmem:[#allocation2] sm:$0x1] }
 0x142   : > { %v803_v39 = vpop.xlane.xlu1 %802 }
 0x143   : > { %v804_v41 = vsel %vm670_vm1, %v803_v39, 0.0 }
 0x144   : > { %v805_v43 = vrot.slane %v804_v41, 4 }
 0x146   : > { %v806_v48 = vadd.f32 %v805_v43, %v804_v41 }
 0x148   : > { %v807_v53 = vrot.slane %v806_v48, 2 }
 0x149   : > { %v852_v40 = vpop.xlane.xlu1 %851 }
 0x14a   : > { %v853_v2 = vsel %vm670_vm1, %v852_v40, 0.0  ;;  %v808_v58 = vadd.f32 %v807_v53, %v806_v48 }
 0x14b   : > { %v854_v42 = vrot.slane %v853_v2, 4 }
 0x14c   : > { %v809_v0 = vrot.slane %v808_v58, 1 }
 0x14d   : > { %v855_v46 = vadd.f32 %v854_v42, %v853_v2 }
 0x14e   : > { %v810_v6 = vadd.f32 %v809_v0, %v808_v58 }
 0x14f   : > { %v856_v50 = vrot.slane %v855_v46, 2 }
 0x151   : > { %v857_v56 = vadd.f32 %v856_v50, %v855_v46 }
 0x153   : > { %v858_v62 = vrot.slane %v857_v56, 1 }
 0x155   : > { %v859_v4 = vadd.f32 %v858_v62, %v857_v56 }
 0x157   : > { %v860_v8 = vadd.f32 %v859_v4, %v810_v6 }
 0x158   : > { %v754_v44 = vpop.xlane.xlu0 %753 }
 0x159   : > { %v755_v45 = vsel %vm670_vm1, %v754_v44, 0.0 }
 0x15a   : > { %v756_v47 = vrot.slane %v755_v45, 4 }
 0x15b   : > { %v952_v3 = vpop.xlane.xlu1 %951 }
 0x15c   : > { %v757_v49 = vadd.f32 %v756_v47, %v755_v45  ;;  %v903_v52 = vpop.xlane.xlu0 %902  ;;  %v953_v5 = vsel %vm670_vm1, %v952_v3, 0.0 }
 0x15d   : > { %v904_v55 = vsel %vm670_vm1, %v903_v52, 0.0  ;;  %v954_v9 = vrot.slane %v953_v5, 4 }
 0x15e   : > { %v758_v51 = vrot.slane %v757_v49, 2  ;;  %v905_v60 = vrot.slane %v904_v55, 4 }
 0x15f   : > { %v955_v14 = vadd.f32 %v954_v9, %v953_v5 }
 0x160   : > { %v759_v54 = vadd.f32 %v758_v51, %v757_v49  ;;  %v906_v1 = vadd.f32 %v905_v60, %v904_v55 }
 0x161   : > { %v956_v17 = vrot.slane %v955_v14, 2 }
 0x162   : > { %v760_v57 = vrot.slane %v759_v54, 1  ;;  %v907_v7 = vrot.slane %v906_v1, 2 }
 0x163   : > { %v957_v22 = vadd.f32 %v956_v17, %v955_v14 }
 0x164   : > { %v761_v59 = vadd.f32 %v760_v57, %v759_v54  ;;  %v908_v13 = vadd.f32 %v907_v7, %v906_v1 }
 0x165   : > { %v958_v23 = vrot.slane %v957_v22, 1 }
 0x166   : > { %v762_v63 = vadd.f32 %v761_v59, %v751_v61  ;;  %v909_v16 = vrot.slane %v908_v13, 1 }
 0x167   : > { %v959_v24 = vadd.f32 %v958_v23, %v957_v22 }
 0x168   : > { %764 = vst.msk [vmem:[#allocation2] sm:$0x1] %vm763_vm3, %v762_v63  ;;  %v910_v18 = vadd.f32 %v909_v16, %v908_v13 }
 0x16f   : > { %v861_v11 = vld [vmem:[#allocation2] sm:$0x1] }
 0x170   : > { %v862_v12 = vadd.f32 %v861_v11, %v860_v8 }
 0x172   : > { %864 = vst.msk [vmem:[#allocation2] sm:$0x1] %vm863_vm4, %v862_v12 }
 0x179   : > { %v896_v20 = vld [vmem:[#allocation2] sm:$0x1] }
 0x17a   : > { %v911_v21 = vadd.f32 %v910_v18, %v896_v20 }
 0x17c   : > { %913 = vst.msk [vmem:[#allocation2] sm:$0x1] %vm912_vm5, %v911_v21 }
 0x183   : > { %v945_v25 = vld [vmem:[#allocation2] sm:$0x1] }
 0x184   : > { %v960_v26 = vadd.f32 %v959_v24, %v945_v25 }
 0x186   : > { %962 = vst.msk [vmem:[#allocation2] sm:$0x1] %vm961_vm6, %v960_v26 }
 0x18d   : > { %v966_v29 = vld [vmem:[#allocation2] sm:$0x1] }
 0x18e   : > { %vm967_vm7 = vcmp.gt.f32.partialorder %v966_v29, 0.0  ;;  %v971_v30 = vmul.f32 0.03125, %v966_v29 }
 0x18f   : > { %v968_v31 = vsel %vm967_vm7, %v966_v29, 256.0 }
 0x190   : > { %1695 = vrcp.f32 %v968_v31  ;;  %972 = vst.msk [vmem:[%s2459_s17] sm:$0x1] %vm763_vm3, %v971_v30 }
 0x191   : > { %1820 = shalt.err (!%p1817_p3)
}
 0x192   : > { %s1821_s1 = scalar_lea.hbm %s1047_s28, 32  ;;  %s1825_s0 = scalar_lea.hbm %s2672_s8, 64 }
 0x193   : > { %p1822_p8 = scmp.ne.s32.totalorder %s1047_s28, %s1821_s1  ;;  %p1826_p5 = scmp.lt.s32.totalorder %s1047_s28, %s2672_s8 }
 0x194   : > { %p1827_p0 = scmp.lt.s32.totalorder %s1825_s0, %s1821_s1 }
 0x195   : > { %p1823_p7 = pnand %p1822_p8, %p2220_p12 }
 0x196   : > { %p1828_p13 = por %p1827_p0, %p1826_p5 }
 0x197   : > { %p1824_p2 = pneg %p1823_p7 }
 0x199   : > { %p1829_p11 = pnand %p1828_p13, %p1824_p2 }
 0x19b   : > { %1832 = shalt.err (!%p1829_p11)
}
 0x19c   : > { %1560 = dma.vmem_to_hbm [thread:$0]  (%p2220_p12), %s1050_s13, 32, %s1047_s28, %s2693_s19  }
 0x19d   : > { %s1078_s26 = scalar_lea.hbm %s2674_s10, %s2466_s29  ;;  %s1080_s15 = sshll.u32 %s634_s9, 4  ;;  %s1081_s15 = int_to_ptr.vmem [resolvable:$true] %s1080_s15 }
 0x19e   : > { %s2692_s14 = scalar_lea.sflag [#allocation18], %s2309_s7  ;;  %s1833_s1 = scalar_lea.vmem %s1081_s15, 32 }
 0x19f   : > { %p1834_p4 = scmp.ne.s32.totalorder %s1081_s15, %s1833_s1  ;;  %s2052_s11 = smov [#allocation17]  }
 0x1a0   : > { %s1837_s18 = sshll.u32 %s2052_s11, 4  ;;  %s1838_s18 = int_to_ptr.vmem [resolvable:$false] %s1837_s18 }
 0x1a1   : > { %p1835_p1 = pnand %p1834_p4, %p2220_p12  ;;  %s1839_s0 = scalar_lea.vmem %s1838_s18, 64 }
 0x1a2   : > { %p1840_p9 = scmp.lt.s32.totalorder %s1081_s15, %s1838_s18  ;;  %p1841_p10 = scmp.lt.s32.totalorder %s1839_s0, %s1833_s1 }
 0x1a3   : > { %p1836_p6 = pneg %p1835_p1 }
 0x1a4   : > { %p1842_p3 = por %p1841_p10, %p1840_p9 }
 0x1a6   : > { %p1843_p8 = pnand %p1842_p3, %p1836_p6 }
 0x1a8   : > { %1846 = shalt.err (!%p1843_p8)
}
 0x1a9   : > { %s1847_s13 = scalar_lea.hbm %s1078_s26, 32  ;;  %s1851_s30 = scalar_lea.hbm %s2674_s10, 64 }
 0x1aa   : > { %p1848_p7 = scmp.ne.s32.totalorder %s1078_s26, %s1847_s13  ;;  %p1852_p0 = scmp.lt.s32.totalorder %s1078_s26, %s2674_s10 }
 0x1ab   : > { %p1853_p13 = scmp.lt.s32.totalorder %s1851_s30, %s1847_s13 }
 0x1ac   : > { %p1849_p2 = pnand %p1848_p7, %p2220_p12 }
 0x1ad   : > { %p1854_p11 = por %p1853_p13, %p1852_p0 }
 0x1ae   : > { %p1850_p5 = pneg %p1849_p2 }
 0x1b0   : > { %p1855_p4 = pnand %p1854_p11, %p1850_p5 }
 0x1b2   : > { %1858 = shalt.err (!%p1855_p4)
}
 0x1b3   : > { %1562 = dma.vmem_to_hbm [thread:$0]  (%p2220_p12), %s1081_s15, 32, %s1078_s26, %s2692_s14   ;;  %v1696_v10 = vpop.eup %1695 }
 0x1b4   : > { %s1544_s4 = smul.u32 192, %s2033_s24  ;;  %s1032_s1 = sshll.u32 %s2365_s21, 4  ;;  %s2515_s1 = int_to_ptr.vmem [resolvable:$true] %s1032_s1 }
 0x1b5   : > { %s2053_s11 = smov 126   ;;  %s2054_s18 = smov 125  }
 0x1b6   : > { %982 = vrot.lane.b32.xlu1 %v1696_v10, %s2053_s11  ;;  %975 = vrot.lane.b32.xlu0 %v1696_v10, %s2054_s18  ;;  %s2730_s9 = sld [smem:[#allocation42_spill]]  ;;  %s994_s30 = scalar_lea.sflag [#allocation5], %s2290_s23 }
 0x1b7   : > { %s1859_s27 = scalar_lea.vmem %s2515_s1, 192  ;;  %s2055_s21 = smov [#allocation13]  }
 0x1b8   : > { %p1860_p1 = scmp.ne.s32.totalorder %s2515_s1, %s1859_s27  ;;  %s1863_s26 = sshll.u32 %s2055_s21, 4  ;;  %s1864_s26 = int_to_ptr.vmem [resolvable:$false] %s1863_s26 }
 0x1b9   : > { %s1865_s15 = scalar_lea.vmem %s1864_s26, 384  ;;  %p1866_p10 = scmp.lt.s32.totalorder %s2515_s1, %s1864_s26 }
 0x1ba   : > { %p1861_p6 = pnand %p1860_p1, %p2220_p12  ;;  %p1867_p3 = scmp.lt.s32.totalorder %s1865_s15, %s1859_s27 }
 0x1bc   : > { %s2520_s28 = scalar_lea.hbm %s2730_s9, %s1544_s4  ;;  %p1862_p9 = pneg %p1861_p6 }
 0x1bd   : > { %p1868_p8 = por %p1867_p3, %p1866_p10 }
 0x1bf   : > { %p1869_p7 = pnand %p1868_p8, %p1862_p9 }
 0x1c1   : > { %1872 = shalt.err (!%p1869_p7)
}
 0x1c2   : > { %s1873_s16 = scalar_lea.hbm %s2520_s28, 192  ;;  %s1877_s18 = scalar_lea.hbm %s2730_s9, 384 }
 0x1c3   : > { %p1874_p2 = scmp.ne.s32.totalorder %s2520_s28, %s1873_s16  ;;  %p1878_p13 = scmp.lt.s32.totalorder %s2520_s28, %s2730_s9 }
 0x1c4   : > { %p1879_p11 = scmp.lt.s32.totalorder %s1877_s18, %s1873_s16 }
 0x1c5   : > { %p1875_p5 = pnand %p1874_p2, %p2220_p12 }
 0x1c6   : > { %p1880_p4 = por %p1879_p11, %p1878_p13 }
 0x1c7   : > { %p1876_p0 = pneg %p1875_p5 }
 0x1c9   : > { %p1881_p1 = pnand %p1880_p4, %p1876_p0 }
 0x1cb   : > { %1884 = shalt.err (!%p1881_p1)
}
 0x1cc   : > { %s2056_s27 = smov 32   ;;  %s2057_s21 = smov 2  }
 0x1cd   : > { %1559 = dma.vmem_to_hbm [thread:$0]  (%p2220_p12), %s2515_s1, 192, %s2520_s28, %s994_s30, %s2056_s27, %s2056_s27, %s2057_s21  }
 0x1ce   : > { %s1542_s26 = sshll.u32 %s2033_s24, 6  ;;  %s2058_s15 = smov 127  }
 0x1cf   : > { %988 = vrot.lane.b32.xlu1 %v1696_v10, %s2058_s15  ;;  %s2731_s11 = sld [smem:[#allocation43_spill]]  ;;  %s641_s0 = scalar_lea.vmem [#allocation19], %s2322_s20 }
 0x1d0   : > { %944 = vst [vmem:[%s641_s0] sm:$0x3] %v2438_v19  ;;  %s2732_s19 = sld [smem:[#allocation44_spill]]  ;;  %s1885_s5 = scalar_lea.vmem %s2463_s2, 64 }
 0x1d1   : > { %p1886_p6 = scmp.ne.s32.totalorder %s2463_s2, %s1885_s5  ;;  %s2059_s1 = smov [#allocation16]  }
 0x1d2   : > { %s1889_s28 = sshll.u32 %s2059_s1, 4  ;;  %s1890_s28 = int_to_ptr.vmem [resolvable:$false] %s1889_s28 }
 0x1d3   : > { %p1887_p9 = pnand %p1886_p6, %p2220_p12  ;;  %s1891_s30 = scalar_lea.vmem %s1890_s28, 128 }
 0x1d4   : > { %p1892_p3 = scmp.lt.s32.totalorder %s2463_s2, %s1890_s28  ;;  %p1893_p8 = scmp.lt.s32.totalorder %s1891_s30, %s1885_s5 }
 0x1d5   : > { %s2552_s18 = scalar_lea.hbm %s2731_s11, %s1542_s26  ;;  %p1888_p10 = pneg %p1887_p9 }
 0x1d6   : > { %s2562_s3 = scalar_lea.hbm %s2732_s19, %s2466_s29  ;;  %p1894_p7 = por %p1893_p8, %p1892_p3 }
 0x1d8   : > { %p1895_p2 = pnand %p1894_p7, %p1888_p10 }
 0x1da   : > { %1898 = shalt.err (!%p1895_p2)
}
 0x1db   : > { %s1899_s29 = scalar_lea.hbm %s2552_s18, 64  ;;  %s1903_s15 = scalar_lea.hbm %s2731_s11, 128 }
 0x1dc   : > { %p1900_p5 = scmp.ne.s32.totalorder %s2552_s18, %s1899_s29  ;;  %p1904_p11 = scmp.lt.s32.totalorder %s2552_s18, %s2731_s11 }
 0x1dd   : > { %p1905_p4 = scmp.lt.s32.totalorder %s1903_s15, %s1899_s29 }
 0x1de   : > { %p1901_p0 = pnand %p1900_p5, %p2220_p12 }
 0x1df   : > { %p1906_p1 = por %p1905_p4, %p1904_p11 }
 0x1e0   : > { %p1902_p13 = pneg %p1901_p0 }
 0x1e2   : > { %p1907_p6 = pnand %p1906_p1, %p1902_p13 }
 0x1e4   : > { %1910 = shalt.err (!%p1907_p6)
}
 0x1e5   : > { %s2733_s5 = scalar_lea.sflag [#allocation15], %s2309_s7  ;;  %s1094_s13 = sshll.u32 %s641_s0, 4  ;;  %s1095_s13 = int_to_ptr.vmem [resolvable:$true] %s1094_s13 }
 0x1e6   : > { %1561 = dma.vmem_to_hbm [thread:$0]  (%p2220_p12), %s2463_s2, 64, %s2552_s18, %s2733_s5, %s2056_s27, %s2056_s27, %s2057_s21  }
 0x1e7   : > { %s1911_s1 = scalar_lea.vmem %s1095_s13, 32  ;;  %s2060_s28 = smov [#allocation19]  }
 0x1e8   : > { %p1912_p9 = scmp.ne.s32.totalorder %s1095_s13, %s1911_s1  ;;  %s1915_s30 = sshll.u32 %s2060_s28, 4  ;;  %s1916_s30 = int_to_ptr.vmem [resolvable:$false] %s1915_s30 }
 0x1e9   : > { %s1917_s29 = scalar_lea.vmem %s1916_s30, 64  ;;  %p1918_p8 = scmp.lt.s32.totalorder %s1095_s13, %s1916_s30 }
 0x1ea   : > { %p1913_p10 = pnand %p1912_p9, %p2220_p12  ;;  %p1919_p7 = scmp.lt.s32.totalorder %s1917_s29, %s1911_s1 }
 0x1ec   : > { %p1914_p3 = pneg %p1913_p10  ;;  %p1920_p2 = por %p1919_p7, %p1918_p8 }
 0x1ee   : > { %p1921_p5 = pnand %p1920_p2, %p1914_p3 }
 0x1f0   : > { %1924 = shalt.err (!%p1921_p5)
}
 0x1f1   : > { %s1925_s20 = scalar_lea.hbm %s2562_s3, 32  ;;  %s1929_s21 = scalar_lea.hbm %s2732_s19, 64 }
 0x1f2   : > { %p1926_p0 = scmp.ne.s32.totalorder %s2562_s3, %s1925_s20  ;;  %p1930_p4 = scmp.lt.s32.totalorder %s2562_s3, %s2732_s19 }
 0x1f3   : > { %p1931_p1 = scmp.lt.s32.totalorder %s1929_s21, %s1925_s20 }
 0x1f4   : > { %p1927_p13 = pnand %p1926_p0, %p2220_p12 }
 0x1f5   : > { %p1932_p6 = por %p1931_p1, %p1930_p4 }
 0x1f6   : > { %p1928_p11 = pneg %p1927_p13 }
 0x1f8   : > { %p1933_p9 = pnand %p1932_p6, %p1928_p11 }
 0x1fa   : > { %1936 = shalt.err (!%p1933_p9)
}
 0x1fb   : > { %s2734_s14 = scalar_lea.sflag [#allocation18], %s2309_s7  ;;  %v973_v33 = vld [vmem:[#allocation2] sm:$0x1]  ;;  %s1537_s26 = sshll.u32 %s2033_s24, 4 }
 0x1fc   : > { %1563 = dma.vmem_to_hbm [thread:$0]  (%p2220_p12), %s1095_s13, 32, %s2562_s3, %s2734_s14   ;;  %v981_v36 = vld [vmem:[#allocation2] sm:$0x1] }
 0x1fd   : > { %s1107_s15 = sshll.u32 %s2459_s17, 4  ;;  %v987_v39 = vld [vmem:[#allocation2] sm:$0x1]  ;;  %s2735_s16 = sld [smem:[#allocation45_spill]]  ;;  %s1108_s15 = int_to_ptr.vmem [resolvable:$true] %s1107_s15 }
 0x1fe   : > { %s1019_s24 = scalar_lea.sflag [#allocation21], %s2290_s23  ;;  %s1937_s5 = scalar_lea.vmem %s1108_s15, 16 }
 0x1ff   : > { %p1938_p10 = scmp.ne.s32.totalorder %s1108_s15, %s1937_s5  ;;  %s2061_s13 = smov [#allocation20]  }
 0x200   : > { %s1941_s1 = sshll.u32 %s2061_s13, 4  ;;  %s1942_s1 = int_to_ptr.vmem [resolvable:$false] %s1941_s1 }
 0x201   : > { %p1939_p3 = pnand %p1938_p10, %p2220_p12  ;;  %s1943_s28 = scalar_lea.vmem %s1942_s1, 32 }
 0x202   : > { %p1944_p7 = scmp.lt.s32.totalorder %s1108_s15, %s1942_s1  ;;  %p1945_p2 = scmp.lt.s32.totalorder %s1943_s28, %s1937_s5 }
 0x203   : > { %s2616_s4 = scalar_lea.hbm %s2735_s16, %s1537_s26  ;;  %p1940_p8 = pneg %p1939_p3 }
 0x204   : > { %p1946_p5 = por %p1945_p2, %p1944_p7 }
 0x206   : > { %p1947_p0 = pnand %p1946_p5, %p1940_p8 }
 0x228   : > { %v983_v19 = vpop.permute.xlu1 %982  ;;  %v976_v34 = vpop.permute.xlu0 %975 }
 0x229   : > { %v978_v35 = vmul.f32 %v976_v34, %v973_v33  ;;  %v985_v38 = vmul.f32 %v983_v19, %v981_v36 }
 0x22b   : > { %v979_v37 = vmul.f32 0.25, %v978_v35 }
 0x22d   : > { %980 = vst.msk [vmem:[%s2459_s17] sm:$0x1] %vm863_vm4, %v979_v37 }
 0x22e   : > { %986 = vst.msk [vmem:[%s2459_s17] sm:$0x1] %vm912_vm5, %v985_v38 }
 0x241   : > { %v989_v40 = vpop.permute.xlu1 %988 }
 0x242   : > { %v991_v2 = vmul.f32 %v989_v40, %v987_v39 }
 0x244   : > { %992 = vst.msk [vmem:[%s2459_s17] sm:$0x1] %vm961_vm6, %v991_v2 }
 0x245   : > { %1950 = shalt.err (!%p1947_p0)
}
 0x246   : > { %s1951_s17 = scalar_lea.hbm %s2616_s4, 16  ;;  %s1955_s29 = scalar_lea.hbm %s2735_s16, 32 }
 0x247   : > { %p1952_p13 = scmp.ne.s32.totalorder %s2616_s4, %s1951_s17  ;;  %p1956_p1 = scmp.lt.s32.totalorder %s2616_s4, %s2735_s16 }
 0x248   : > { %p1957_p6 = scmp.lt.s32.totalorder %s1955_s29, %s1951_s17 }
 0x249   : > { %p1953_p11 = pnand %p1952_p13, %p2220_p12 }
 0x24a   : > { %p1958_p9 = por %p1957_p6, %p1956_p1 }
 0x24b   : > { %p1954_p4 = pneg %p1953_p11 }
 0x24d   : > { %p1959_p10 = pnand %p1958_p9, %p1954_p4 }
 0x24f   : > { %1962 = shalt.err (!%p1959_p10)
}
 0x250   : > { %1564 = dma.vmem_to_hbm [thread:$0]  (%p2220_p12), %s1108_s15, 16, %s2616_s4, %s1019_s24  }
 0x251 PF: > { %s2736_s27 = sld [smem:[#allocation30_spill]] }
 0x252   : > { %s2737_s21 = sld [smem:[#allocation35_spill]] }
 0x253   : > { %s2738_s18 = sld [smem:[#allocation32_spill]] }
 0x257   : > { %s1119_s0 = sand.u32 1, %s2736_s27  }
 0x258   : > { %p2739_p3 = scmp.ne.s32.totalorder %s2737_s21, 0  ;;  %s1120_s14 = scalar_lea.sflag [#allocation5], %s1119_s0 }
 0x259   : > { %p2740_p8 = scmp.ge.s32.totalorder %s2738_s18, 2 }
 0x25b   : > { %p1589_p7 = pnand %p2740_p8, %p2739_p3 }
 0x25d   : > { %p1590_p2 = pneg %p1589_p7 }
 0x25f   : > { %2004 = dma.done.wait (%p1590_p2), %s1120_s14, 192  }
 0x260   : > { %2006 = vsyncadd (%p1590_p2), %s1120_s14, 4294967104  ;;  %s2741_s26 = sadd.s32 4294967294, %s2738_s18  }
 0x261   : > { %s1128_s7 = sand.u32 1, %s2741_s26  }
 0x262   : > { %s1129_s3 = scalar_lea.sflag [#allocation15], %s1128_s7 }
 0x263   : > { %2008 = dma.done.wait (%p1590_p2), %s1129_s3, 96  }
 0x264   : > { %2010 = vsyncadd (%p1590_p2), %s1129_s3, 4294967200  ;;  %s1147_s12 = scalar_lea.sflag [#allocation18], %s1128_s7 }
 0x265   : > { %2012 = dma.done.wait (%p1590_p2), %s1147_s12, 64  }
 0x266   : > { %2014 = vsyncadd (%p1590_p2), %s1147_s12, 4294967232  ;;  %s1165_s15 = scalar_lea.sflag [#allocation21], %s1119_s0 }
 0x267   : > { %2016 = dma.done.wait (%p1590_p2), %s1165_s15, 16  }
 0x268   : > { %2018 = vsyncadd (%p1590_p2), %s1165_s15, 4294967280  ;;  %s43_s26 = sadd.s32 1, %s2738_s18   ;;  %s2742_s4 = sld [smem:[#allocation31_spill]] }
 0x269   : > { %p40_p12 = scmp.ge.s32.totalorder %s43_s26, 4   ;;  %s2743_s23 = sld [smem:[#allocation34_spill]] }
 0x26a   : > { %s2744_s5 = sld [smem:[#allocation33_spill]]  ;;  %s2745_s21 = smov %s2025_s22 }
 0x26b   : > { %s2747_s24 = smov %s2037_s25 }
 0x26c   :  { %42 = sbr.rel (!%p40_p12) target bundleno = 27 (0x1b), region = 232 }
 0x26e   : > { %s2746_s22 = smov %s2742_s4 }
 0x270   : > { %s2748_s25 = smov %s2744_s5 }
 0x271   :  { %1169 = vsyncpa [#allocation4], 1 }
 0x272   :  { %1171 = vsyncpa [#allocation4 + $0x1], 1 }
 0x273   :  { %1172 = vsyncpa [#allocation11], 1 }
 0x274   :  { %1174 = vsyncpa [#allocation11 + $0x1], 1 }
 0x275   :  { %1175 = vsyncpa [#allocation5], 1 }
 0x276   :  { %1177 = vsyncpa [#allocation5 + $0x1], 1 }
 0x277   :  { %1178 = vsyncpa [#allocation15], 1 }
 0x278   :  { %1180 = vsyncpa [#allocation15 + $0x1], 1 }
 0x279   :  { %1181 = vsyncpa [#allocation18], 1 }
 0x27a   :  { %1183 = vsyncpa [#allocation18 + $0x1], 1 }
 0x27b   :  { %1184 = vsyncpa [#allocation21], 1 }
 0x27c   :  { %1186 = vsyncpa [#allocation21 + $0x1], 1 }
 0x27d   :  { %1187 = vsyncpa [#allocation6], 1 }
 0x27e   :  { %1189 = vsyncpa [#allocation6 + $0x1], 1 }
 0x27f   :  { %1190 = vsyncpa [#allocation7], 1 }
 0x280   :  { %1192 = vsyncpa [#allocation7 + $0x1], 1 }

</bundles_post_ra>
